<compile_context>
chip_gen: v6e
topology: v6e:2x2x1
jax: 0.10.0
libtpu: 0.0.40
codegen_flags: <defaults>
</compile_context>

<pallas_src>
import functools
import math
from dataclasses import dataclass

import jax
import jax.numpy as jnp
import numpy as np
from jax.experimental import pallas as pl
from jax.experimental.pallas import tpu as pltpu


# ----------------------------- config ---------------------------------------
@dataclass
class TransformerConfig:
    hidden_size: int = 32
    num_heads: int = 4
    ffn_size: int = 64
    num_layers: int = 2
    eps: float = 1e-5


# ----------------------------- fused decoder kernel --------------------------
def _make_kernel(*, B_blk, St, Ss, H, F, nh, dh, eps, causal, has_tmask, has_mmask):
    bf16 = jnp.bfloat16
    f32 = jnp.float32

    def kernel(*refs):
        it = iter(refs)
        tgt_ref = next(it)
        mem_ref = next(it)
        tmask_ref = next(it) if has_tmask else None
        mmask_ref = next(it) if has_mmask else None
        w_attn_ref = next(it)   # (1, 8H, H)  bf16: [q_s,k_s,v_s,o_s,q_c,k_c,v_c,o_c]
        w1_ref = next(it)       # (1, H, F)   bf16
        w2_ref = next(it)       # (1, F, H)   bf16
        vecs_ref = next(it)     # (1, 16, W)  f32 bias/LN rows (lane-padded to W)
        out_ref = next(it)      # (B_blk, St, H) f32 -- also the carried activation

        layer = pl.program_id(1)
        N = B_blk * St

        # Layer 0: seed the carried activation (out block is resident across layers).
        @pl.when(layer == 0)
        def _init():
            out_ref[...] = tgt_ref[...]

        x = out_ref[...].reshape(N, H)                       # f32 carry
        mem = mem_ref[0].reshape(B_blk * Ss, H)              # this layer's memory

        w_attn = w_attn_ref[0]
        w1 = w1_ref[0]
        w2 = w2_ref[0]
        vecs = vecs_ref[0]

        def vrow(r, width=H):
            return vecs[r:r + 1, :width]                     # (1, width) f32

        def wmat(i):
            return w_attn[i * H:(i + 1) * H, :]              # (H, H) bf16

        def layernorm(h, g, b):                              # fused residual+LN (f32)
            mu = jnp.mean(h, axis=-1, keepdims=True)
            var = jnp.mean(jnp.square(h - mu), axis=-1, keepdims=True)
            return (h - mu) * jax.lax.rsqrt(var + eps) * g + b

        # ---- additive masks (f32), shared across heads; batch order = (head, batch)
        tmask = None
        if causal:
            qi = jax.lax.broadcasted_iota(jnp.int32, (St, St), 0)
            ki = jax.lax.broadcasted_iota(jnp.int32, (St, St), 1)
            tmask = jnp.where(ki > qi, jnp.float32(-1e9), jnp.float32(0.0))[None]
        if has_tmask:
            m = jnp.broadcast_to(tmask_ref[...][None], (nh, B_blk, St, St))
            m = m.reshape(nh * B_blk, St, St)
            tmask = m if tmask is None else tmask + m
        mmask = None
        if has_mmask:
            m = jnp.broadcast_to(mmask_ref[...][None], (nh, B_blk, St, Ss))
            mmask = m.reshape(nh * B_blk, St, Ss)

        def split_heads(t2d, S):
            # (B_blk*S, H) f32 -> (nh*B_blk, S, dh) f32, heads-major batch (no minor
            # dim transposes: only leading-dim stack/reshape + lane slices).
            parts = [t2d[:, hi * dh:(hi + 1) * dh] for hi in range(nh)]
            return jnp.stack(parts, axis=0).reshape(nh * B_blk, S, dh)

        def merge_heads(o, S):
            # (nh*B_blk, S, dh) f32 -> (B_blk*S, H)
            o = o.reshape(nh, B_blk * S, dh)
            return jnp.concatenate([o[hi] for hi in range(nh)], axis=-1)

        def attention(q2d, k2d, v2d, Sq, Sk, mask):
            # single batched einsum over (nh*B_blk); bf16 MXU operands, f32 accum.
            qh = split_heads(q2d, Sq).astype(bf16)
            kh = split_heads(k2d, Sk).astype(bf16)
            vh = split_heads(v2d, Sk).astype(bf16)
            s = jnp.einsum("bqd,bkd->bqk", qh, kh, preferred_element_type=f32)
            if mask is not None:
                s = s + mask
            s = s - jnp.max(s, axis=-1, keepdims=True)
            p = jnp.exp(s)
            p = p * pl.reciprocal(jnp.sum(p, axis=-1, keepdims=True), approx=True)
            o = jnp.einsum("bqk,bkd->bqd", p.astype(bf16), vh,
                           preferred_element_type=f32)
            return merge_heads(o, Sq)

        def proj(inp_b, wi, bi):
            return jnp.dot(inp_b, wmat(wi), preferred_element_type=f32) + vrow(bi)

        # ---- self attention (1/sqrt(dh) folded into q weight & bias) ----
        xb = x.astype(bf16)
        a = attention(proj(xb, 0, 0), proj(xb, 1, 1), proj(xb, 2, 2), St, St, tmask)
        sa = jnp.dot(a.astype(bf16), wmat(3), preferred_element_type=f32) + vrow(3)
        x = layernorm(sa + x, vrow(9), vrow(10))

        # ---- cross attention against this layer's memory ----
        xb = x.astype(bf16)
        memb = mem.astype(bf16)
        ac = attention(proj(xb, 4, 4), proj(memb, 5, 5), proj(memb, 6, 6),
                       St, Ss, mmask)
        ca = jnp.dot(ac.astype(bf16), wmat(7), preferred_element_type=f32) + vrow(7)
        x = layernorm(ca + x, vrow(11), vrow(12))

        # ---- FFN (Linear -> ReLU -> Linear) + residual + LN ----
        # TODO(synk): FeedForwardNetwork definition not provided; assuming Linear-ReLU-Linear.
        h = jnp.maximum(
            jnp.dot(x.astype(bf16), w1, preferred_element_type=f32) + vrow(15, F), 0.0)
        z = jnp.dot(h.astype(bf16), w2, preferred_element_type=f32) + vrow(8)
        x = layernorm(z + x, vrow(13), vrow(14))

        out_ref[...] = x.reshape(B_blk, St, H)   # carried to the next layer (VMEM)

    return kernel


# ----------------------------- wrapper ----------------------------------------
def transformer_decoder_fused(fused, tgt, memory_stacked, config, *,
                              tgt_mask=None, mem_mask=None, causal=False,
                              batch_block=1):
    B, St, H = tgt.shape
    L, _, Ss, _ = memory_stacked.shape
    nh = config.num_heads
    dh = H // nh
    F = config.ffn_size
    bb = batch_block
    assert B % bb == 0
    nbt = B // bb

    has_tmask = tgt_mask is not None
    has_mmask = mem_mask is not None

    kernel = _make_kernel(B_blk=bb, St=St, Ss=Ss, H=H, F=F, nh=nh, dh=dh,
                          eps=config.eps, causal=causal,
                          has_tmask=has_tmask, has_mmask=has_mmask)

    in_specs = [
        pl.BlockSpec((bb, St, H), lambda bt, l: (bt, 0, 0)),          # tgt
        pl.BlockSpec((1, bb, Ss, H), lambda bt, l: (l, bt, 0, 0)),    # memory[l]
    ]
    inputs = [tgt, memory_stacked]
    if has_tmask:
        in_specs.append(pl.BlockSpec((bb, St, St), lambda bt, l: (bt, 0, 0)))
        inputs.append(tgt_mask)
    if has_mmask:
        in_specs.append(pl.BlockSpec((bb, St, Ss), lambda bt, l: (bt, 0, 0)))
        inputs.append(mem_mask)

    wa, w1, w2, vecs = fused["w_attn"], fused["w1"], fused["w2"], fused["vecs"]
    in_specs += [
        pl.BlockSpec((1,) + wa.shape[1:], lambda bt, l: (l, 0, 0)),
        pl.BlockSpec((1,) + w1.shape[1:], lambda bt, l: (l, 0, 0)),
        pl.BlockSpec((1,) + w2.shape[1:], lambda bt, l: (l, 0, 0)),
        pl.BlockSpec((1,) + vecs.shape[1:], lambda bt, l: (l, 0, 0)),
    ]
    inputs += [wa, w1, w2, vecs]

    return pl.pallas_call(
        kernel,
        out_shape=jax.ShapeDtypeStruct((B, St, H), jnp.float32),
        grid_spec=pltpu.PrefetchScalarGridSpec(
            num_scalar_prefetch=0,
            grid=(nbt, L),                       # batch tiles (parallel), layers (arbitrary)
            in_specs=in_specs,
            out_specs=pl.BlockSpec((bb, St, H), lambda bt, l: (bt, 0, 0)),
        ),
        compiler_params=pltpu.CompilerParams(
            dimension_semantics=("parallel", "arbitrary"),
            vmem_limit_bytes=48 * 1024 * 1024,   # headroom below v7x's 64 MiB
        ),
    )(*inputs)


# ----------------------------- param prep -------------------------------------
def prepare_fused_params(params, config):
    """Pack per-layer weights into a few slabs: one bf16 (8H,H) attention-weight slab,
    bf16 FFN matrices, and one f32 (16,W) slab of all bias/LayerNorm rows.  The
    1/sqrt(dh) softmax scale is folded into the Q weights/biases."""
    H, F = config.hidden_size, config.ffn_size
    dh = H // config.num_heads
    scale = 1.0 / math.sqrt(dh)
    W = max(H, F)

    def pad_row(v):
        v = v.reshape(-1)
        return jnp.pad(v, (0, W - v.shape[0]))

    w_attn_l, w1_l, w2_l, vec_l = [], [], [], []
    for p in params:
        mats = [p["self"]["q"][0] * scale, p["self"]["k"][0], p["self"]["v"][0],
                p["self"]["o"][0],
                p["cross"]["q"][0] * scale, p["cross"]["k"][0], p["cross"]["v"][0],
                p["cross"]["o"][0]]
        w_attn_l.append(jnp.concatenate(mats, axis=0).astype(jnp.bfloat16))
        w1_l.append(p["ffn"]["w1"][0].astype(jnp.bfloat16))
        w2_l.append(p["ffn"]["w2"][0].astype(jnp.bfloat16))
        rows = [
            p["self"]["q"][1] * scale, p["self"]["k"][1], p["self"]["v"][1],
            p["self"]["o"][1],
            p["cross"]["q"][1] * scale, p["cross"]["k"][1], p["cross"]["v"][1],
            p["cross"]["o"][1],
            p["ffn"]["w2"][1],
            p["norm1"][0], p["norm1"][1],
            p["norm2"][0], p["norm2"][1],
            p["norm3"][0], p["norm3"][1],
            p["ffn"]["w1"][1],
        ]
        vec_l.append(jnp.stack([pad_row(r) for r in rows], axis=0))

    return {
        "w_attn": jnp.stack(w_attn_l, axis=0),                      # (L, 8H, H) bf16
        "w1": jnp.stack(w1_l, axis=0),                              # (L, H, F)  bf16
        "w2": jnp.stack(w2_l, axis=0),                              # (L, F, H)  bf16
        "vecs": jnp.stack(vec_l, axis=0).astype(jnp.float32),       # (L, 16, W) f32
    }


def build_additive_mask(B, Sq, Sk, key_padding_mask=None, attn_mask=None):
    m = jnp.zeros((B, Sq, Sk), jnp.float32)
    if key_padding_mask is not None:
        m = m + jnp.where(key_padding_mask[:, None, :], -1e9, 0.0)
    if attn_mask is not None:
        if attn_mask.dtype == jnp.bool_:
            m = m + jnp.where(attn_mask[None, :, :], -1e9, 0.0)
        else:
            m = m + attn_mask[None, :, :].astype(jnp.float32)
    return m


# ----------------------------- pure-JAX reference ------------------------------
def ref_decoder(params, tgt, memory_tuple, config, tgt_attn_mask=None):
    B, St, H = tgt.shape
    nh, d, eps = config.num_heads, config.hidden_size // config.num_heads, config.eps
    Ss = memory_tuple[0].shape[1]
    tgt_mask = build_additive_mask(B, St, St, None, tgt_attn_mask)[:, None]
    mem_mask = build_additive_mask(B, St, Ss, None, None)[:, None]

    def ln(h, g, b):
        mu = jnp.mean(h, -1, keepdims=True)
        var = jnp.mean(jnp.square(h - mu), -1, keepdims=True)
        return (h - mu) * jax.lax.rsqrt(var + eps) * g + b

    def mha(p, q_in, kv_in, mask):
        pr = lambda x, wb: x @ wb[0] + wb[1]
        q, k, v = pr(q_in, p["q"]), pr(kv_in, p["k"]), pr(kv_in, p["v"])
        sh = lambda t: t.reshape(t.shape[0], t.shape[1], nh, d).transpose(0, 2, 1, 3)
        qh, kh, vh = sh(q), sh(k), sh(v)
        s = jnp.einsum("bhqd,bhkd->bhqk", qh, kh) / math.sqrt(d) + mask
        s = s - jnp.max(s, -1, keepdims=True)
        w = jnp.exp(s)
        w = w / jnp.sum(w, -1, keepdims=True)
        o = jnp.einsum("bhqk,bhkd->bhqd", w, vh).transpose(0, 2, 1, 3)
        o = o.reshape(q_in.shape[0], -1, H)
        return pr(o, p["o"])

    x = tgt
    for i, p in enumerate(params):
        a = mha(p["self"], x, x, tgt_mask)
        x = ln(a + x, p["norm1"][0], p["norm1"][1])
        a = mha(p["cross"], x, memory_tuple[i], mem_mask)
        x = ln(a + x, p["norm2"][0], p["norm2"][1])
        h = jnp.maximum(x @ p["ffn"]["w1"][0] + p["ffn"]["w1"][1], 0.0)
        z = h @ p["ffn"]["w2"][0] + p["ffn"]["w2"][1]
        x = ln(z + x, p["norm3"][0], p["norm3"][1])
    return x


# ----------------------------- params ------------------------------------------
def init_params(config, key):
    H, F = config.hidden_size, config.ffn_size
    keys = iter(jax.random.split(key, config.num_layers * 10 + 2))

    def lin(kin, kout):
        return (0.02 * jax.random.normal(next(keys), (kin, kout), jnp.float32),
                jnp.zeros((kout,), jnp.float32))

    layers = []
    for _ in range(config.num_layers):
        layers.append({
            "self": {n: lin(H, H) for n in ("q", "k", "v", "o")},
            "cross": {n: lin(H, H) for n in ("q", "k", "v", "o")},
            "ffn": {"w1": lin(H, F), "w2": lin(F, H)},
            "norm1": (jnp.ones((H,), jnp.float32), jnp.zeros((H,), jnp.float32)),
            "norm2": (jnp.ones((H,), jnp.float32), jnp.zeros((H,), jnp.float32)),
            "norm3": (jnp.ones((H,), jnp.float32), jnp.zeros((H,), jnp.float32)),
        })
    return layers


# ----------------------------- main ---------------------------------------------
if __name__ == "__main__":
    config = TransformerConfig(hidden_size=32, num_heads=4, ffn_size=64, num_layers=2)
    B, St, Ss, H = 2, 8, 8, config.hidden_size

    key = jax.random.PRNGKey(0)
    k_p, k_t, k_m = jax.random.split(key, 3)
    params = init_params(config, k_p)

    tgt = jax.random.normal(k_t, (B, St, H), jnp.float32)
    mem_keys = jax.random.split(k_m, config.num_layers)
    memory_tuple = tuple(
        jax.random.normal(mem_keys[i], (B, Ss, H), jnp.float32)
        for i in range(config.num_layers))
    memory_stacked = jnp.stack(memory_tuple, axis=0)            # (L, B, Ss, H)

    # causal self-attention mask (True = masked) -- built IN-KERNEL from iota;
    # only the reference needs the explicit array.
    causal_bool = jnp.triu(jnp.ones((St, St), jnp.bool_), k=1)

    fused = prepare_fused_params(params, config)

    @jax.jit
    def run(fused, tgt, memory_stacked):
        return transformer_decoder_fused(fused, tgt, memory_stacked, config,
                                         causal=True, batch_block=1)

    out = jax.block_until_ready(run(fused, tgt, memory_stacked))

    ref = ref_decoder(params, tgt, memory_tuple, config, tgt_attn_mask=causal_bool)
    # bf16 MXU operands (per perf review) vs f32 reference -> relaxed tolerance.
    np.testing.assert_allclose(np.asarray(out), np.asarray(ref), rtol=2e-2, atol=2e-2)

    assert out.shape == (B, St, H)
    print("KERNEL_OK")
</pallas_src>

<mosaic_0001>
module attributes {stable_mosaic.version = 11 : i64} {
  func.func @kernel(%arg0: i32, %arg1: i32, %arg2: memref<1x8x32xf32, #tpu.memory_space<vmem>>, %arg3: memref<1x1x8x32xf32, #tpu.memory_space<vmem>>, %arg4: memref<1x256x32xbf16, #tpu.memory_space<vmem>>, %arg5: memref<1x32x64xbf16, #tpu.memory_space<vmem>>, %arg6: memref<1x64x32xbf16, #tpu.memory_space<vmem>>, %arg7: memref<1x16x64xf32, #tpu.memory_space<vmem>>, %arg8: memref<1x8x32xf32, #tpu.memory_space<vmem>>) attributes {dimension_semantics = [#tpu.dimension_semantics<parallel>, #tpu.dimension_semantics<arbitrary>], iteration_bounds = array<i64: 2, 2>, scalar_prefetch = 0 : i64, scratch_operands = 0 : i64, tpu.core_type = #tpu.core_type<tc>, window_params = [{transform_indices = @transform_0, window_bounds = array<i64: 1, 8, 32>}, {transform_indices = @transform_1, window_bounds = array<i64: 1, 1, 8, 32>}, {transform_indices = @transform_2, window_bounds = array<i64: 1, 256, 32>}, {transform_indices = @transform_3, window_bounds = array<i64: 1, 32, 64>}, {transform_indices = @transform_4, window_bounds = array<i64: 1, 64, 32>}, {transform_indices = @transform_5, window_bounds = array<i64: 1, 16, 64>}, {transform_indices = @transform_6, window_bounds = array<i64: 1, 8, 32>}]} {
    %c0_i32 = arith.constant 0 : i32
    %0 = arith.cmpi eq, %arg1, %c0_i32 : i32
    %1 = arith.extui %0 : i1 to i32
    %c0_i32_0 = arith.constant 0 : i32
    %2 = arith.cmpi ne, %1, %c0_i32_0 : i32
    scf.if %2 {
      %c0_57 = arith.constant 0 : index
      %c0_58 = arith.constant 0 : index
      %c0_59 = arith.constant 0 : index
      %263 = vector.load %arg2[%c0_57, %c0_58, %c0_59] : memref<1x8x32xf32, #tpu.memory_space<vmem>>, vector<1x8x32xf32>
      %c0_60 = arith.constant 0 : index
      %c0_61 = arith.constant 0 : index
      %c0_62 = arith.constant 0 : index
      %264 = vector.load %arg8[%c0_60, %c0_61, %c0_62] : memref<1x8x32xf32, #tpu.memory_space<vmem>>, vector<1x8x32xf32>
      tpu.vector_store %arg8[%c0_60, %c0_61, %c0_62], %263 {strides = array<i32>} : memref<1x8x32xf32, #tpu.memory_space<vmem>>, vector<1x8x32xf32>,
    } else {
    }
    %c0 = arith.constant 0 : index
    %c0_1 = arith.constant 0 : index
    %c0_2 = arith.constant 0 : index
    %3 = vector.load %arg8[%c0, %c0_1, %c0_2] : memref<1x8x32xf32, #tpu.memory_space<vmem>>, vector<1x8x32xf32>
    %4 = vector.shape_cast %3 : vector<1x8x32xf32> to vector<8x32xf32>
    %c0_3 = arith.constant 0 : index
    %c0_4 = arith.constant 0 : index
    %c0_5 = arith.constant 0 : index
    %c0_6 = arith.constant 0 : index
    %5 = vector.load %arg3[%c0_3, %c0_4, %c0_5, %c0_6] : memref<1x1x8x32xf32, #tpu.memory_space<vmem>>, vector<1x1x8x32xf32>
    %6 = vector.shape_cast %5 : vector<1x1x8x32xf32> to vector<1x8x32xf32>
    %7 = vector.shape_cast %6 : vector<1x8x32xf32> to vector<8x32xf32>
    %c0_7 = arith.constant 0 : index
    %c0_8 = arith.constant 0 : index
    %c0_9 = arith.constant 0 : index
    %8 = vector.load %arg4[%c0_7, %c0_8, %c0_9] : memref<1x256x32xbf16, #tpu.memory_space<vmem>>, vector<1x256x32xbf16>
    %9 = vector.shape_cast %8 : vector<1x256x32xbf16> to vector<256x32xbf16>
    %c0_10 = arith.constant 0 : index
    %c0_11 = arith.constant 0 : index
    %c0_12 = arith.constant 0 : index
    %10 = vector.load %arg5[%c0_10, %c0_11, %c0_12] : memref<1x32x64xbf16, #tpu.memory_space<vmem>>, vector<1x32x64xbf16>
    %11 = vector.shape_cast %10 : vector<1x32x64xbf16> to vector<32x64xbf16>
    %c0_13 = arith.constant 0 : index
    %c0_14 = arith.constant 0 : index
    %c0_15 = arith.constant 0 : index
    %12 = vector.load %arg6[%c0_13, %c0_14, %c0_15] : memref<1x64x32xbf16, #tpu.memory_space<vmem>>, vector<1x64x32xbf16>
    %13 = vector.shape_cast %12 : vector<1x64x32xbf16> to vector<64x32xbf16>
    %c0_16 = arith.constant 0 : index
    %c0_17 = arith.constant 0 : index
    %c0_18 = arith.constant 0 : index
    %14 = vector.load %arg7[%c0_16, %c0_17, %c0_18] : memref<1x16x64xf32, #tpu.memory_space<vmem>>, vector<1x16x64xf32>
    %15 = vector.shape_cast %14 : vector<1x16x64xf32> to vector<16x64xf32>
    %16 = tpu.iota {dimensions = array<i32: 0>} : vector<8x8xi32>
    %17 = tpu.iota {dimensions = array<i32: 1>} : vector<8x8xi32>
    %18 = arith.cmpi sgt, %17, %16 : vector<8x8xi32>
    %cst = arith.constant -1.000000e+09 : f32
    %cst_19 = arith.constant 0.000000e+00 : f32
    %19 = vector.broadcast %cst : f32 to vector<8x8xf32>
    %20 = vector.broadcast %cst_19 : f32 to vector<8x8xf32>
    %21 = arith.select %18, %19, %20 : vector<8x8xi1>, vector<8x8xf32>
    %22 = vector.shape_cast %21 : vector<8x8xf32> to vector<1x8x8xf32>
    %23 = arith.truncf %4 : vector<8x32xf32> to vector<8x32xbf16>
    %24 = vector.extract_strided_slice %9 {offsets = [0, 0], sizes = [32, 32], strides = [1, 1]} : vector<256x32xbf16> to vector<32x32xbf16>
    %cst_20 = arith.constant dense<0.000000e+00> : vector<8x32xf32>
    %25 = tpu.matmul %23, %24, %cst_20 {dimension_numbers = #tpu.dot_dimension_numbers<[1], [0], [0], [1], [0, 0, 1, 1], [], []>} : vector<8x32xbf16>, vector<32x32xbf16>, vector<8x32xf32> -> vector<8x32xf32>
    %26 = vector.extract_strided_slice %15 {offsets = [0, 0], sizes = [1, 32], strides = [1, 1]} : vector<16x64xf32> to vector<1x32xf32>
    %27 = vector.broadcast %26 : vector<1x32xf32> to vector<8x32xf32>
    %28 = arith.addf %25, %27 : vector<8x32xf32>
    %29 = vector.extract_strided_slice %9 {offsets = [32, 0], sizes = [32, 32], strides = [1, 1]} : vector<256x32xbf16> to vector<32x32xbf16>
    %cst_21 = arith.constant dense<0.000000e+00> : vector<8x32xf32>
    %30 = tpu.matmul %23, %29, %cst_21 {dimension_numbers = #tpu.dot_dimension_numbers<[1], [0], [0], [1], [0, 0, 1, 1], [], []>} : vector<8x32xbf16>, vector<32x32xbf16>, vector<8x32xf32> -> vector<8x32xf32>
    %31 = vector.extract_strided_slice %15 {offsets = [1, 0], sizes = [1, 32], strides = [1, 1]} : vector<16x64xf32> to vector<1x32xf32>
    %32 = vector.broadcast %31 : vector<1x32xf32> to vector<8x32xf32>
    %33 = arith.addf %30, %32 : vector<8x32xf32>
    %34 = vector.extract_strided_slice %9 {offsets = [64, 0], sizes = [32, 32], strides = [1, 1]} : vector<256x32xbf16> to vector<32x32xbf16>
    %cst_22 = arith.constant dense<0.000000e+00> : vector<8x32xf32>
    %35 = tpu.matmul %23, %34, %cst_22 {dimension_numbers = #tpu.dot_dimension_numbers<[1], [0], [0], [1], [0, 0, 1, 1], [], []>} : vector<8x32xbf16>, vector<32x32xbf16>, vector<8x32xf32> -> vector<8x32xf32>
    %36 = vector.extract_strided_slice %15 {offsets = [2, 0], sizes = [1, 32], strides = [1, 1]} : vector<16x64xf32> to vector<1x32xf32>
    %37 = vector.broadcast %36 : vector<1x32xf32> to vector<8x32xf32>
    %38 = arith.addf %35, %37 : vector<8x32xf32>
    %39 = vector.extract_strided_slice %28 {offsets = [0, 0], sizes = [8, 8], strides = [1, 1]} : vector<8x32xf32> to vector<8x8xf32>
    %40 = vector.extract_strided_slice %28 {offsets = [0, 8], sizes = [8, 8], strides = [1, 1]} : vector<8x32xf32> to vector<8x8xf32>
    %41 = vector.extract_strided_slice %28 {offsets = [0, 16], sizes = [8, 8], strides = [1, 1]} : vector<8x32xf32> to vector<8x8xf32>
    %42 = vector.extract_strided_slice %28 {offsets = [0, 24], sizes = [8, 8], strides = [1, 1]} : vector<8x32xf32> to vector<8x8xf32>
    %43 = vector.shape_cast %39 : vector<8x8xf32> to vector<1x8x8xf32>
    %44 = vector.shape_cast %40 : vector<8x8xf32> to vector<1x8x8xf32>
    %45 = vector.shape_cast %41 : vector<8x8xf32> to vector<1x8x8xf32>
    %46 = vector.shape_cast %42 : vector<8x8xf32> to vector<1x8x8xf32>
    %47 = tpu.concatenate %43, %44, %45, %46 in 0 : vector<1x8x8xf32>, vector<1x8x8xf32>, vector<1x8x8xf32>, vector<1x8x8xf32> -> vector<4x8x8xf32>
    %48 = arith.truncf %47 : vector<4x8x8xf32> to vector<4x8x8xbf16>
    %49 = vector.extract_strided_slice %33 {offsets = [0, 0], sizes = [8, 8], strides = [1, 1]} : vector<8x32xf32> to vector<8x8xf32>
    %50 = vector.extract_strided_slice %33 {offsets = [0, 8], sizes = [8, 8], strides = [1, 1]} : vector<8x32xf32> to vector<8x8xf32>
    %51 = vector.extract_strided_slice %33 {offsets = [0, 16], sizes = [8, 8], strides = [1, 1]} : vector<8x32xf32> to vector<8x8xf32>
    %52 = vector.extract_strided_slice %33 {offsets = [0, 24], sizes = [8, 8], strides = [1, 1]} : vector<8x32xf32> to vector<8x8xf32>
    %53 = vector.shape_cast %49 : vector<8x8xf32> to vector<1x8x8xf32>
    %54 = vector.shape_cast %50 : vector<8x8xf32> to vector<1x8x8xf32>
    %55 = vector.shape_cast %51 : vector<8x8xf32> to vector<1x8x8xf32>
    %56 = vector.shape_cast %52 : vector<8x8xf32> to vector<1x8x8xf32>
    %57 = tpu.concatenate %53, %54, %55, %56 in 0 : vector<1x8x8xf32>, vector<1x8x8xf32>, vector<1x8x8xf32>, vector<1x8x8xf32> -> vector<4x8x8xf32>
    %58 = arith.truncf %57 : vector<4x8x8xf32> to vector<4x8x8xbf16>
    %59 = vector.extract_strided_slice %38 {offsets = [0, 0], sizes = [8, 8], strides = [1, 1]} : vector<8x32xf32> to vector<8x8xf32>
    %60 = vector.extract_strided_slice %38 {offsets = [0, 8], sizes = [8, 8], strides = [1, 1]} : vector<8x32xf32> to vector<8x8xf32>
    %61 = vector.extract_strided_slice %38 {offsets = [0, 16], sizes = [8, 8], strides = [1, 1]} : vector<8x32xf32> to vector<8x8xf32>
    %62 = vector.extract_strided_slice %38 {offsets = [0, 24], sizes = [8, 8], strides = [1, 1]} : vector<8x32xf32> to vector<8x8xf32>
    %63 = vector.shape_cast %59 : vector<8x8xf32> to vector<1x8x8xf32>
    %64 = vector.shape_cast %60 : vector<8x8xf32> to vector<1x8x8xf32>
    %65 = vector.shape_cast %61 : vector<8x8xf32> to vector<1x8x8xf32>
    %66 = vector.shape_cast %62 : vector<8x8xf32> to vector<1x8x8xf32>
    %67 = tpu.concatenate %63, %64, %65, %66 in 0 : vector<1x8x8xf32>, vector<1x8x8xf32>, vector<1x8x8xf32>, vector<1x8x8xf32> -> vector<4x8x8xf32>
    %68 = arith.truncf %67 : vector<4x8x8xf32> to vector<4x8x8xbf16>
    "tpu.trace_start"() <{level = 10 : i32, message = "bqd,bkd->bqk"}> : () -> ()
    %cst_23 = arith.constant dense<0.000000e+00> : vector<4x8x8xf32>
    %69 = tpu.matmul %48, %58, %cst_23 {dimension_numbers = #tpu.dot_dimension_numbers<[2], [2], [1], [1], [0, 0, 0, 1, 1, 1], [0], [0]>} : vector<4x8x8xbf16>, vector<4x8x8xbf16>, vector<4x8x8xf32> -> vector<4x8x8xf32>
    "tpu.trace_stop"() : () -> ()
    %70 = vector.broadcast %22 : vector<1x8x8xf32> to vector<4x8x8xf32>
    %71 = arith.addf %69, %70 : vector<4x8x8xf32>
    %cst_24 = arith.constant dense<0xFF800000> : vector<4x8xf32>
    %72 = vector.multi_reduction <maximumf>, %71, %cst_24 [2] : vector<4x8x8xf32> to vector<4x8xf32>
    %73 = vector.shape_cast %72 : vector<4x8xf32> to vector<4x8x1xf32>
    %74 = vector.broadcast %73 : vector<4x8x1xf32> to vector<4x8x8xf32>
    %75 = arith.subf %71, %74 : vector<4x8x8xf32>
    %76 = math.exp %75 : vector<4x8x8xf32>
    %cst_25 = arith.constant dense<0.000000e+00> : vector<4x8xf32>
    %77 = vector.multi_reduction <add>, %76, %cst_25 [2] : vector<4x8x8xf32> to vector<4x8xf32>
    %78 = vector.shape_cast %77 : vector<4x8xf32> to vector<4x8x1xf32>
    %79 = tpu.reciprocal %78 {approx = true} : vector<4x8x1xf32> -> vector<4x8x1xf32>
    %80 = vector.broadcast %79 : vector<4x8x1xf32> to vector<4x8x8xf32>
    %81 = arith.mulf %76, %80 : vector<4x8x8xf32>
    %82 = arith.truncf %81 : vector<4x8x8xf32> to vector<4x8x8xbf16>
    "tpu.trace_start"() <{level = 10 : i32, message = "bqk,bkd->bqd"}> : () -> ()
    %cst_26 = arith.constant dense<0.000000e+00> : vector<4x8x8xf32>
    %83 = tpu.matmul %82, %68, %cst_26 {dimension_numbers = #tpu.dot_dimension_numbers<[2], [1], [1], [2], [0, 0, 0, 1, 1, 2], [0], [0]>} : vector<4x8x8xbf16>, vector<4x8x8xbf16>, vector<4x8x8xf32> -> vector<4x8x8xf32>
    "tpu.trace_stop"() : () -> ()
    %84 = vector.extract_strided_slice %83 {offsets = [0, 0, 0], sizes = [1, 8, 8], strides = [1, 1, 1]} : vector<4x8x8xf32> to vector<1x8x8xf32>
    %85 = vector.shape_cast %84 : vector<1x8x8xf32> to vector<8x8xf32>
    %86 = vector.extract_strided_slice %83 {offsets = [1, 0, 0], sizes = [1, 8, 8], strides = [1, 1, 1]} : vector<4x8x8xf32> to vector<1x8x8xf32>
    %87 = vector.shape_cast %86 : vector<1x8x8xf32> to vector<8x8xf32>
    %88 = vector.extract_strided_slice %83 {offsets = [2, 0, 0], sizes = [1, 8, 8], strides = [1, 1, 1]} : vector<4x8x8xf32> to vector<1x8x8xf32>
    %89 = vector.shape_cast %88 : vector<1x8x8xf32> to vector<8x8xf32>
    %90 = vector.extract_strided_slice %83 {offsets = [3, 0, 0], sizes = [1, 8, 8], strides = [1, 1, 1]} : vector<4x8x8xf32> to vector<1x8x8xf32>
    %91 = vector.shape_cast %90 : vector<1x8x8xf32> to vector<8x8xf32>
    %92 = tpu.concatenate %85, %87, %89, %91 in 1 : vector<8x8xf32>, vector<8x8xf32>, vector<8x8xf32>, vector<8x8xf32> -> vector<8x32xf32>
    %93 = arith.truncf %92 : vector<8x32xf32> to vector<8x32xbf16>
    %94 = vector.extract_strided_slice %9 {offsets = [96, 0], sizes = [32, 32], strides = [1, 1]} : vector<256x32xbf16> to vector<32x32xbf16>
    %cst_27 = arith.constant dense<0.000000e+00> : vector<8x32xf32>
    %95 = tpu.matmul %93, %94, %cst_27 {dimension_numbers = #tpu.dot_dimension_numbers<[1], [0], [0], [1], [0, 0, 1, 1], [], []>} : vector<8x32xbf16>, vector<32x32xbf16>, vector<8x32xf32> -> vector<8x32xf32>
    %96 = vector.extract_strided_slice %15 {offsets = [3, 0], sizes = [1, 32], strides = [1, 1]} : vector<16x64xf32> to vector<1x32xf32>
    %97 = vector.broadcast %96 : vector<1x32xf32> to vector<8x32xf32>
    %98 = arith.addf %95, %97 : vector<8x32xf32>
    %99 = arith.addf %98, %4 : vector<8x32xf32>
    %100 = vector.extract_strided_slice %15 {offsets = [9, 0], sizes = [1, 32], strides = [1, 1]} : vector<16x64xf32> to vector<1x32xf32>
    %101 = vector.extract_strided_slice %15 {offsets = [10, 0], sizes = [1, 32], strides = [1, 1]} : vector<16x64xf32> to vector<1x32xf32>
    %cst_28 = arith.constant dense<0.000000e+00> : vector<8xf32>
    %102 = vector.multi_reduction <add>, %99, %cst_28 [1] : vector<8x32xf32> to vector<8xf32>
    %103 = vector.shape_cast %102 : vector<8xf32> to vector<8x1xf32>
    %cst_29 = arith.constant 3.200000e+01 : f32
    %104 = vector.broadcast %cst_29 : f32 to vector<8x1xf32>
    %105 = arith.divf %103, %104 : vector<8x1xf32>
    %106 = vector.broadcast %105 : vector<8x1xf32> to vector<8x32xf32>
    %107 = arith.subf %99, %106 : vector<8x32xf32>
    %108 = arith.mulf %107, %107 : vector<8x32xf32>
    %cst_30 = arith.constant dense<0.000000e+00> : vector<8xf32>
    %109 = vector.multi_reduction <add>, %108, %cst_30 [1] : vector<8x32xf32> to vector<8xf32>
    %110 = vector.shape_cast %109 : vector<8xf32> to vector<8x1xf32>
    %cst_31 = arith.constant 3.200000e+01 : f32
    %111 = vector.broadcast %cst_31 : f32 to vector<8x1xf32>
    %112 = arith.divf %110, %111 : vector<8x1xf32>
    %113 = vector.broadcast %105 : vector<8x1xf32> to vector<8x32xf32>
    %114 = arith.subf %99, %113 : vector<8x32xf32>
    %cst_32 = arith.constant 9.99999974E-6 : f32
    %115 = vector.broadcast %cst_32 : f32 to vector<8x1xf32>
    %116 = arith.addf %112, %115 : vector<8x1xf32>
    %117 = math.rsqrt %116 : vector<8x1xf32>
    %118 = vector.broadcast %117 : vector<8x1xf32> to vector<8x32xf32>
    %119 = arith.mulf %114, %118 : vector<8x32xf32>
    %120 = vector.broadcast %100 : vector<1x32xf32> to vector<8x32xf32>
    %121 = arith.mulf %119, %120 : vector<8x32xf32>
    %122 = vector.broadcast %101 : vector<1x32xf32> to vector<8x32xf32>
    %123 = arith.addf %121, %122 : vector<8x32xf32>
    %124 = arith.truncf %123 : vector<8x32xf32> to vector<8x32xbf16>
    %125 = arith.truncf %7 : vector<8x32xf32> to vector<8x32xbf16>
    %126 = vector.extract_strided_slice %9 {offsets = [128, 0], sizes = [32, 32], strides = [1, 1]} : vector<256x32xbf16> to vector<32x32xbf16>
    %cst_33 = arith.constant dense<0.000000e+00> : vector<8x32xf32>
    %127 = tpu.matmul %124, %126, %cst_33 {dimension_numbers = #tpu.dot_dimension_numbers<[1], [0], [0], [1], [0, 0, 1, 1], [], []>} : vector<8x32xbf16>, vector<32x32xbf16>, vector<8x32xf32> -> vector<8x32xf32>
    %128 = vector.extract_strided_slice %15 {offsets = [4, 0], sizes = [1, 32], strides = [1, 1]} : vector<16x64xf32> to vector<1x32xf32>
    %129 = vector.broadcast %128 : vector<1x32xf32> to vector<8x32xf32>
    %130 = arith.addf %127, %129 : vector<8x32xf32>
    %131 = vector.extract_strided_slice %9 {offsets = [160, 0], sizes = [32, 32], strides = [1, 1]} : vector<256x32xbf16> to vector<32x32xbf16>
    %cst_34 = arith.constant dense<0.000000e+00> : vector<8x32xf32>
    %132 = tpu.matmul %125, %131, %cst_34 {dimension_numbers = #tpu.dot_dimension_numbers<[1], [0], [0], [1], [0, 0, 1, 1], [], []>} : vector<8x32xbf16>, vector<32x32xbf16>, vector<8x32xf32> -> vector<8x32xf32>
    %133 = vector.extract_strided_slice %15 {offsets = [5, 0], sizes = [1, 32], strides = [1, 1]} : vector<16x64xf32> to vector<1x32xf32>
    %134 = vector.broadcast %133 : vector<1x32xf32> to vector<8x32xf32>
    %135 = arith.addf %132, %134 : vector<8x32xf32>
    %136 = vector.extract_strided_slice %9 {offsets = [192, 0], sizes = [32, 32], strides = [1, 1]} : vector<256x32xbf16> to vector<32x32xbf16>
    %cst_35 = arith.constant dense<0.000000e+00> : vector<8x32xf32>
    %137 = tpu.matmul %125, %136, %cst_35 {dimension_numbers = #tpu.dot_dimension_numbers<[1], [0], [0], [1], [0, 0, 1, 1], [], []>} : vector<8x32xbf16>, vector<32x32xbf16>, vector<8x32xf32> -> vector<8x32xf32>
    %138 = vector.extract_strided_slice %15 {offsets = [6, 0], sizes = [1, 32], strides = [1, 1]} : vector<16x64xf32> to vector<1x32xf32>
    %139 = vector.broadcast %138 : vector<1x32xf32> to vector<8x32xf32>
    %140 = arith.addf %137, %139 : vector<8x32xf32>
    %141 = vector.extract_strided_slice %130 {offsets = [0, 0], sizes = [8, 8], strides = [1, 1]} : vector<8x32xf32> to vector<8x8xf32>
    %142 = vector.extract_strided_slice %130 {offsets = [0, 8], sizes = [8, 8], strides = [1, 1]} : vector<8x32xf32> to vector<8x8xf32>
    %143 = vector.extract_strided_slice %130 {offsets = [0, 16], sizes = [8, 8], strides = [1, 1]} : vector<8x32xf32> to vector<8x8xf32>
    %144 = vector.extract_strided_slice %130 {offsets = [0, 24], sizes = [8, 8], strides = [1, 1]} : vector<8x32xf32> to vector<8x8xf32>
    %145 = vector.shape_cast %141 : vector<8x8xf32> to vector<1x8x8xf32>
    %146 = vector.shape_cast %142 : vector<8x8xf32> to vector<1x8x8xf32>
    %147 = vector.shape_cast %143 : vector<8x8xf32> to vector<1x8x8xf32>
    %148 = vector.shape_cast %144 : vector<8x8xf32> to vector<1x8x8xf32>
    %149 = tpu.concatenate %145, %146, %147, %148 in 0 : vector<1x8x8xf32>, vector<1x8x8xf32>, vector<1x8x8xf32>, vector<1x8x8xf32> -> vector<4x8x8xf32>
    %150 = arith.truncf %149 : vector<4x8x8xf32> to vector<4x8x8xbf16>
    %151 = vector.extract_strided_slice %135 {offsets = [0, 0], sizes = [8, 8], strides = [1, 1]} : vector<8x32xf32> to vector<8x8xf32>
    %152 = vector.extract_strided_slice %135 {offsets = [0, 8], sizes = [8, 8], strides = [1, 1]} : vector<8x32xf32> to vector<8x8xf32>
    %153 = vector.extract_strided_slice %135 {offsets = [0, 16], sizes = [8, 8], strides = [1, 1]} : vector<8x32xf32> to vector<8x8xf32>
    %154 = vector.extract_strided_slice %135 {offsets = [0, 24], sizes = [8, 8], strides = [1, 1]} : vector<8x32xf32> to vector<8x8xf32>
    %155 = vector.shape_cast %151 : vector<8x8xf32> to vector<1x8x8xf32>
    %156 = vector.shape_cast %152 : vector<8x8xf32> to vector<1x8x8xf32>
    %157 = vector.shape_cast %153 : vector<8x8xf32> to vector<1x8x8xf32>
    %158 = vector.shape_cast %154 : vector<8x8xf32> to vector<1x8x8xf32>
    %159 = tpu.concatenate %155, %156, %157, %158 in 0 : vector<1x8x8xf32>, vector<1x8x8xf32>, vector<1x8x8xf32>, vector<1x8x8xf32> -> vector<4x8x8xf32>
    %160 = arith.truncf %159 : vector<4x8x8xf32> to vector<4x8x8xbf16>
    %161 = vector.extract_strided_slice %140 {offsets = [0, 0], sizes = [8, 8], strides = [1, 1]} : vector<8x32xf32> to vector<8x8xf32>
    %162 = vector.extract_strided_slice %140 {offsets = [0, 8], sizes = [8, 8], strides = [1, 1]} : vector<8x32xf32> to vector<8x8xf32>
    %163 = vector.extract_strided_slice %140 {offsets = [0, 16], sizes = [8, 8], strides = [1, 1]} : vector<8x32xf32> to vector<8x8xf32>
    %164 = vector.extract_strided_slice %140 {offsets = [0, 24], sizes = [8, 8], strides = [1, 1]} : vector<8x32xf32> to vector<8x8xf32>
    %165 = vector.shape_cast %161 : vector<8x8xf32> to vector<1x8x8xf32>
    %166 = vector.shape_cast %162 : vector<8x8xf32> to vector<1x8x8xf32>
    %167 = vector.shape_cast %163 : vector<8x8xf32> to vector<1x8x8xf32>
    %168 = vector.shape_cast %164 : vector<8x8xf32> to vector<1x8x8xf32>
    %169 = tpu.concatenate %165, %166, %167, %168 in 0 : vector<1x8x8xf32>, vector<1x8x8xf32>, vector<1x8x8xf32>, vector<1x8x8xf32> -> vector<4x8x8xf32>
    %170 = arith.truncf %169 : vector<4x8x8xf32> to vector<4x8x8xbf16>
    "tpu.trace_start"() <{level = 10 : i32, message = "bqd,bkd->bqk"}> : () -> ()
    %cst_36 = arith.constant dense<0.000000e+00> : vector<4x8x8xf32>
    %171 = tpu.matmul %150, %160, %cst_36 {dimension_numbers = #tpu.dot_dimension_numbers<[2], [2], [1], [1], [0, 0, 0, 1, 1, 1], [0], [0]>} : vector<4x8x8xbf16>, vector<4x8x8xbf16>, vector<4x8x8xf32> -> vector<4x8x8xf32>
    "tpu.trace_stop"() : () -> ()
    %cst_37 = arith.constant dense<0xFF800000> : vector<4x8xf32>
    %172 = vector.multi_reduction <maximumf>, %171, %cst_37 [2] : vector<4x8x8xf32> to vector<4x8xf32>
    %173 = vector.shape_cast %172 : vector<4x8xf32> to vector<4x8x1xf32>
    %174 = vector.broadcast %173 : vector<4x8x1xf32> to vector<4x8x8xf32>
    %175 = arith.subf %171, %174 : vector<4x8x8xf32>
    %176 = math.exp %175 : vector<4x8x8xf32>
    %cst_38 = arith.constant dense<0.000000e+00> : vector<4x8xf32>
    %177 = vector.multi_reduction <add>, %176, %cst_38 [2] : vector<4x8x8xf32> to vector<4x8xf32>
    %178 = vector.shape_cast %177 : vector<4x8xf32> to vector<4x8x1xf32>
    %179 = tpu.reciprocal %178 {approx = true} : vector<4x8x1xf32> -> vector<4x8x1xf32>
    %180 = vector.broadcast %179 : vector<4x8x1xf32> to vector<4x8x8xf32>
    %181 = arith.mulf %176, %180 : vector<4x8x8xf32>
    %182 = arith.truncf %181 : vector<4x8x8xf32> to vector<4x8x8xbf16>
    "tpu.trace_start"() <{level = 10 : i32, message = "bqk,bkd->bqd"}> : () -> ()
    %cst_39 = arith.constant dense<0.000000e+00> : vector<4x8x8xf32>
    %183 = tpu.matmul %182, %170, %cst_39 {dimension_numbers = #tpu.dot_dimension_numbers<[2], [1], [1], [2], [0, 0, 0, 1, 1, 2], [0], [0]>} : vector<4x8x8xbf16>, vector<4x8x8xbf16>, vector<4x8x8xf32> -> vector<4x8x8xf32>
    "tpu.trace_stop"() : () -> ()
    %184 = vector.extract_strided_slice %183 {offsets = [0, 0, 0], sizes = [1, 8, 8], strides = [1, 1, 1]} : vector<4x8x8xf32> to vector<1x8x8xf32>
    %185 = vector.shape_cast %184 : vector<1x8x8xf32> to vector<8x8xf32>
    %186 = vector.extract_strided_slice %183 {offsets = [1, 0, 0], sizes = [1, 8, 8], strides = [1, 1, 1]} : vector<4x8x8xf32> to vector<1x8x8xf32>
    %187 = vector.shape_cast %186 : vector<1x8x8xf32> to vector<8x8xf32>
    %188 = vector.extract_strided_slice %183 {offsets = [2, 0, 0], sizes = [1, 8, 8], strides = [1, 1, 1]} : vector<4x8x8xf32> to vector<1x8x8xf32>
    %189 = vector.shape_cast %188 : vector<1x8x8xf32> to vector<8x8xf32>
    %190 = vector.extract_strided_slice %183 {offsets = [3, 0, 0], sizes = [1, 8, 8], strides = [1, 1, 1]} : vector<4x8x8xf32> to vector<1x8x8xf32>
    %191 = vector.shape_cast %190 : vector<1x8x8xf32> to vector<8x8xf32>
    %192 = tpu.concatenate %185, %187, %189, %191 in 1 : vector<8x8xf32>, vector<8x8xf32>, vector<8x8xf32>, vector<8x8xf32> -> vector<8x32xf32>
    %193 = arith.truncf %192 : vector<8x32xf32> to vector<8x32xbf16>
    %194 = vector.extract_strided_slice %9 {offsets = [224, 0], sizes = [32, 32], strides = [1, 1]} : vector<256x32xbf16> to vector<32x32xbf16>
    %cst_40 = arith.constant dense<0.000000e+00> : vector<8x32xf32>
    %195 = tpu.matmul %193, %194, %cst_40 {dimension_numbers = #tpu.dot_dimension_numbers<[1], [0], [0], [1], [0, 0, 1, 1], [], []>} : vector<8x32xbf16>, vector<32x32xbf16>, vector<8x32xf32> -> vector<8x32xf32>
    %196 = vector.extract_strided_slice %15 {offsets = [7, 0], sizes = [1, 32], strides = [1, 1]} : vector<16x64xf32> to vector<1x32xf32>
    %197 = vector.broadcast %196 : vector<1x32xf32> to vector<8x32xf32>
    %198 = arith.addf %195, %197 : vector<8x32xf32>
    %199 = arith.addf %198, %123 : vector<8x32xf32>
    %200 = vector.extract_strided_slice %15 {offsets = [11, 0], sizes = [1, 32], strides = [1, 1]} : vector<16x64xf32> to vector<1x32xf32>
    %201 = vector.extract_strided_slice %15 {offsets = [12, 0], sizes = [1, 32], strides = [1, 1]} : vector<16x64xf32> to vector<1x32xf32>
    %cst_41 = arith.constant dense<0.000000e+00> : vector<8xf32>
    %202 = vector.multi_reduction <add>, %199, %cst_41 [1] : vector<8x32xf32> to vector<8xf32>
    %203 = vector.shape_cast %202 : vector<8xf32> to vector<8x1xf32>
    %cst_42 = arith.constant 3.200000e+01 : f32
    %204 = vector.broadcast %cst_42 : f32 to vector<8x1xf32>
    %205 = arith.divf %203, %204 : vector<8x1xf32>
    %206 = vector.broadcast %205 : vector<8x1xf32> to vector<8x32xf32>
    %207 = arith.subf %199, %206 : vector<8x32xf32>
    %208 = arith.mulf %207, %207 : vector<8x32xf32>
    %cst_43 = arith.constant dense<0.000000e+00> : vector<8xf32>
    %209 = vector.multi_reduction <add>, %208, %cst_43 [1] : vector<8x32xf32> to vector<8xf32>
    %210 = vector.shape_cast %209 : vector<8xf32> to vector<8x1xf32>
    %cst_44 = arith.constant 3.200000e+01 : f32
    %211 = vector.broadcast %cst_44 : f32 to vector<8x1xf32>
    %212 = arith.divf %210, %211 : vector<8x1xf32>
    %213 = vector.broadcast %205 : vector<8x1xf32> to vector<8x32xf32>
    %214 = arith.subf %199, %213 : vector<8x32xf32>
    %cst_45 = arith.constant 9.99999974E-6 : f32
    %215 = vector.broadcast %cst_45 : f32 to vector<8x1xf32>
    %216 = arith.addf %212, %215 : vector<8x1xf32>
    %217 = math.rsqrt %216 : vector<8x1xf32>
    %218 = vector.broadcast %217 : vector<8x1xf32> to vector<8x32xf32>
    %219 = arith.mulf %214, %218 : vector<8x32xf32>
    %220 = vector.broadcast %200 : vector<1x32xf32> to vector<8x32xf32>
    %221 = arith.mulf %219, %220 : vector<8x32xf32>
    %222 = vector.broadcast %201 : vector<1x32xf32> to vector<8x32xf32>
    %223 = arith.addf %221, %222 : vector<8x32xf32>
    %224 = arith.truncf %223 : vector<8x32xf32> to vector<8x32xbf16>
    %cst_46 = arith.constant dense<0.000000e+00> : vector<8x64xf32>
    %225 = tpu.matmul %224, %11, %cst_46 {dimension_numbers = #tpu.dot_dimension_numbers<[1], [0], [0], [1], [0, 0, 1, 1], [], []>} : vector<8x32xbf16>, vector<32x64xbf16>, vector<8x64xf32> -> vector<8x64xf32>
    %226 = vector.extract_strided_slice %15 {offsets = [15, 0], sizes = [1, 64], strides = [1, 1]} : vector<16x64xf32> to vector<1x64xf32>
    %227 = vector.broadcast %226 : vector<1x64xf32> to vector<8x64xf32>
    %228 = arith.addf %225, %227 : vector<8x64xf32>
    %cst_47 = arith.constant 0.000000e+00 : f32
    %229 = vector.broadcast %cst_47 : f32 to vector<8x64xf32>
    %230 = arith.maximumf %228, %229 : vector<8x64xf32>
    %231 = arith.truncf %230 : vector<8x64xf32> to vector<8x64xbf16>
    %cst_48 = arith.constant dense<0.000000e+00> : vector<8x32xf32>
    %232 = tpu.matmul %231, %13, %cst_48 {dimension_numbers = #tpu.dot_dimension_numbers<[1], [0], [0], [1], [0, 0, 1, 1], [], []>} : vector<8x64xbf16>, vector<64x32xbf16>, vector<8x32xf32> -> vector<8x32xf32>
    %233 = vector.extract_strided_slice %15 {offsets = [8, 0], sizes = [1, 32], strides = [1, 1]} : vector<16x64xf32> to vector<1x32xf32>
    %234 = vector.broadcast %233 : vector<1x32xf32> to vector<8x32xf32>
    %235 = arith.addf %232, %234 : vector<8x32xf32>
    %236 = arith.addf %235, %223 : vector<8x32xf32>
    %237 = vector.extract_strided_slice %15 {offsets = [13, 0], sizes = [1, 32], strides = [1, 1]} : vector<16x64xf32> to vector<1x32xf32>
    %238 = vector.extract_strided_slice %15 {offsets = [14, 0], sizes = [1, 32], strides = [1, 1]} : vector<16x64xf32> to vector<1x32xf32>
    %cst_49 = arith.constant dense<0.000000e+00> : vector<8xf32>
    %239 = vector.multi_reduction <add>, %236, %cst_49 [1] : vector<8x32xf32> to vector<8xf32>
    %240 = vector.shape_cast %239 : vector<8xf32> to vector<8x1xf32>
    %cst_50 = arith.constant 3.200000e+01 : f32
    %241 = vector.broadcast %cst_50 : f32 to vector<8x1xf32>
    %242 = arith.divf %240, %241 : vector<8x1xf32>
    %243 = vector.broadcast %242 : vector<8x1xf32> to vector<8x32xf32>
    %244 = arith.subf %236, %243 : vector<8x32xf32>
    %245 = arith.mulf %244, %244 : vector<8x32xf32>
    %cst_51 = arith.constant dense<0.000000e+00> : vector<8xf32>
    %246 = vector.multi_reduction <add>, %245, %cst_51 [1] : vector<8x32xf32> to vector<8xf32>
    %247 = vector.shape_cast %246 : vector<8xf32> to vector<8x1xf32>
    %cst_52 = arith.constant 3.200000e+01 : f32
    %248 = vector.broadcast %cst_52 : f32 to vector<8x1xf32>
    %249 = arith.divf %247, %248 : vector<8x1xf32>
    %250 = vector.broadcast %242 : vector<8x1xf32> to vector<8x32xf32>
    %251 = arith.subf %236, %250 : vector<8x32xf32>
    %cst_53 = arith.constant 9.99999974E-6 : f32
    %252 = vector.broadcast %cst_53 : f32 to vector<8x1xf32>
    %253 = arith.addf %249, %252 : vector<8x1xf32>
    %254 = math.rsqrt %253 : vector<8x1xf32>
    %255 = vector.broadcast %254 : vector<8x1xf32> to vector<8x32xf32>
    %256 = arith.mulf %251, %255 : vector<8x32xf32>
    %257 = vector.broadcast %237 : vector<1x32xf32> to vector<8x32xf32>
    %258 = arith.mulf %256, %257 : vector<8x32xf32>
    %259 = vector.broadcast %238 : vector<1x32xf32> to vector<8x32xf32>
    %260 = arith.addf %258, %259 : vector<8x32xf32>
    %261 = vector.shape_cast %260 : vector<8x32xf32> to vector<1x8x32xf32>
    %c0_54 = arith.constant 0 : index
    %c0_55 = arith.constant 0 : index
    %c0_56 = arith.constant 0 : index
    %262 = vector.load %arg8[%c0_54, %c0_55, %c0_56] : memref<1x8x32xf32, #tpu.memory_space<vmem>>, vector<1x8x32xf32>
    tpu.vector_store %arg8[%c0_54, %c0_55, %c0_56], %261 {strides = array<i32>} : memref<1x8x32xf32, #tpu.memory_space<vmem>>, vector<1x8x32xf32>,
    return
  }
  func.func @transform_0(%arg0: i32, %arg1: i32) -> (i32, i32, i32) {
    %c0_i32 = arith.constant 0 : i32
    %c0_i32_0 = arith.constant 0 : i32
    %c0_i32_1 = arith.constant 0 : i32
    return %arg0, %c0_i32, %c0_i32_0 : i32, i32, i32
  }
  func.func @transform_1(%arg0: i32, %arg1: i32) -> (i32, i32, i32, i32) {
    %c0_i32 = arith.constant 0 : i32
    %c0_i32_0 = arith.constant 0 : i32
    %c0_i32_1 = arith.constant 0 : i32
    return %arg1, %arg0, %c0_i32, %c0_i32_0 : i32, i32, i32, i32
  }
  func.func @transform_2(%arg0: i32, %arg1: i32) -> (i32, i32, i32) {
    %c0_i32 = arith.constant 0 : i32
    %c0_i32_0 = arith.constant 0 : i32
    %c0_i32_1 = arith.constant 0 : i32
    return %arg1, %c0_i32, %c0_i32_0 : i32, i32, i32
  }
  func.func @transform_3(%arg0: i32, %arg1: i32) -> (i32, i32, i32) {
    %c0_i32 = arith.constant 0 : i32
    %c0_i32_0 = arith.constant 0 : i32
    %c0_i32_1 = arith.constant 0 : i32
    return %arg1, %c0_i32, %c0_i32_0 : i32, i32, i32
  }
  func.func @transform_4(%arg0: i32, %arg1: i32) -> (i32, i32, i32) {
    %c0_i32 = arith.constant 0 : i32
    %c0_i32_0 = arith.constant 0 : i32
    %c0_i32_1 = arith.constant 0 : i32
    return %arg1, %c0_i32, %c0_i32_0 : i32, i32, i32
  }
  func.func @transform_5(%arg0: i32, %arg1: i32) -> (i32, i32, i32) {
    %c0_i32 = arith.constant 0 : i32
    %c0_i32_0 = arith.constant 0 : i32
    %c0_i32_1 = arith.constant 0 : i32
    return %arg1, %c0_i32, %c0_i32_0 : i32, i32, i32
  }
  func.func @transform_6(%arg0: i32, %arg1: i32) -> (i32, i32, i32) {
    %c0_i32 = arith.constant 0 : i32
    %c0_i32_0 = arith.constant 0 : i32
    %c0_i32_1 = arith.constant 0 : i32
    return %arg0, %c0_i32, %c0_i32_0 : i32, i32, i32
  }
}

</mosaic_0001>

<bundles_post_ra>
// kernel: run.1
= control target key start
LH: loop header
LB: loop body
LE: loop exit
PB: predicated region body
PF: predicated region fallthrough
CT: control target
= control target key end

     0   :  { %11 = vsyncpa [#allocation3], 0  ;;  %s3256_s0 = inlined_call_operand.vmem [shape: f32[2,8,32], index: 0, kind: input, shape index: {}]   ;;  %s3257_s1 = inlined_call_operand.vmem [shape: f32[2,2,8,32], index: 1, kind: input, shape index: {}]   ;;  %s3258_s2 = inlined_call_operand.vmem [shape: bf16[2,256,32], index: 2, kind: input, shape index: {}]   ;;  %s3259_s3 = inlined_call_operand.vmem [shape: bf16[2,32,64], index: 3, kind: input, shape index: {}]   ;;  %s3260_s4 = inlined_call_operand.vmem [shape: bf16[2,64,32], index: 4, kind: input, shape index: {}]   ;;  %s3261_s5 = inlined_call_operand.vmem [shape: f32[2,16,64], index: 5, kind: input, shape index: {}]   ;;  %s3262_s6 = inlined_call_operand.hbm [shape: f32[2,8,32], index: 6, kind: output, shape index: {}]  }
   0x1   :  { %13 = vsyncpa [#allocation3 + $0x1], 0  ;;  %s2804_s21 = smov 0   ;;  %s2806_s22 = smov 0  }
   0x2   :  { %s2808_s23 = smov 0   ;;  %s2810_s24 = smov 0  }
   0x3   :  { %s2812_s25 = smov 0   ;;  %s2814_s26 = smov 0  }
   0x4   :  { %s2816_s27 = smov 0   ;;  %s2818_s28 = smov 0  }
   0x5 LB: > { %3272 = sst [smem:[#allocation5_spill]] %s2730_s21  ;;  %s2209_s29 = sadd.s32 4294967295, %s2758_s28   ;;  %s2758_s28 = sphi %s2818_s28, %s19_s28   ;;  %s2754_s27 = sphi %s2816_s27, %s3292_s27   ;;  %s2750_s26 = sphi %s2814_s26, %s3295_s26   ;;  %s2746_s25 = sphi %s2812_s25, %s3290_s25   ;;  %s2742_s24 = sphi %s2810_s24, %s3289_s24   ;;  %s2738_s23 = sphi %s2808_s23, %s3288_s23   ;;  %s2734_s22 = sphi %s2806_s22, %s3294_s22   ;;  %s2730_s21 = sphi %s2804_s21, %s3293_s21  }
   0x6   : > { %3273 = sst [smem:[#allocation6_spill]] %s2738_s23  ;;  %s2210_s30 = sadd.s32 4294967294, %s2758_s28  }
   0x7   : > { %3274 = sst [smem:[#allocation7_spill]] %s2750_s26  ;;  %s28_s7 = sadd.s32 1, %s2750_s26 }
   0x8   : > { %3275 = sst [smem:[#allocation8_spill]] %s2754_s27  ;;  %p29_p0 = scmp.ge.s32.totalorder %s28_s7, 2 }
   0x9   : > { %3276 = sst [smem:[#allocation9_spill]] %s2758_s28  ;;  %s31_s8 = sadd.s32 1, %s2754_s27 }
   0xa   : > { %p206_p1 = scmp.ne.s32.totalorder %s2738_s23, %s2734_s22  ;;  %p207_p2 = scmp.eq.s32.totalorder %s2209_s29, 3 }
   0xb   : > { %s3297_s7 = smov (%p29_p0, %s28_s7), 0  ;;  %s3299_s8 = smov (!%p29_p0, %s31_s8), %s2754_s27 }
   0xc   : > { %3277 = sst [smem:[#allocation10_spill]] %s3297_s7  ;;  %p2853_p3 = por %p207_p2, %p206_p1 }
   0xd   : > { %p212_p4 = scmp.ne.s32.totalorder %s2734_s22, %s2730_s21  ;;  %p33_p5 = scmp.ge.s32.totalorder %s3299_s8, 2 }
   0xe   : > { %p213_p6 = scmp.eq.s32.totalorder %s2210_s30, 3  ;;  %p2213_p7 = scmp.ge.s32.totalorder %s2758_s28, 1 }
   0xf   : > { %p281_p8 = scmp.lt.s32.totalorder %s2758_s28, 5  ;;  %s3301_s8 = smov (%p33_p5, %s3299_s8), 0 }
  0x10   : > { %3279 = sst [smem:[#allocation11_spill]] %s3301_s8  ;;  %p2863_p9 = por %p213_p6, %p212_p4 }
  0x11   : > { %p282_p10 = pnand %p2213_p7, %p281_p8  ;;  %s193_s11 = ssub.s32 %s2754_s27, %s3301_s8 }
  0x12   : > { %s3280_s10 = scalar_select %p2863_p9, 1, 0 }
  0x13   : > { %s196_s12 = sadd.s32 1, %s2738_s23  ;;  %p194_p11 = scmp.eq.s32.totalorder %s193_s11, 0 }
  0x14   : > { %3281 = sst [smem:[#allocation12_spill]] %s3280_s10  ;;  %285 = sbr.rel (%p282_p10) target bundleno = 4068 (0xfe4), region = 44 }
  0x15   : > { %s2871_s13 = scalar_select %p194_p11, %s2738_s23, %s196_s12  }
  0x16   : > { %s3267_s14 = sand.u32 (!%p282_p10), 1, %s2734_s22   ;;  %p338_p12 = scmp.lt.s32.totalorder (!%p282_p10), %s2746_s25, 1 }
  0x17   : > { %3282 = sst [smem:[#allocation13_spill]] %s2871_s13  ;;  %s2214_s15 = sshll.u32 (!%p282_p10), %s3267_s14, 3 }
  0x18   : > { %p342_p13 = scmp.lt.s32.totalorder (!%p282_p10), %s2742_s24, 1  ;;  %s2908_s23 = scalar_lea.vmem (!%p282_p10), [#allocation2], %s2214_s15 }
  0x19   : > { %s339_s16 = scalar_select %p338_p12, %s2746_s25, 1 }
  0x1a   : > { %s343_s17 = scalar_select %p342_p13, %s2742_s24, 1 }
  0x1b   : > { %s2215_s18 = sshll.u32 %s339_s16, 3  ;;  %p2226_p0 = scmp.ne.s32.totalorder %s2742_s24, 0 }
  0x1c   : > { %s341_s29 = scalar_lea.vmem %s3256_s0, %s2215_s18  ;;  %s2216_s30 = sshll.u32 %s343_s17, 1 }
  0x1d   : > { %s347_s11 = sadd.s32 %s2216_s30, %s339_s16  ;;  %s2279_s12 = sshll.u32 %s343_s17, 7 }
  0x1e   : > { %s2217_s8 = sshll.u32 %s347_s11, 3  ;;  %s2886_s26 = scalar_lea.vmem %s3258_s2, %s2279_s12 }
  0x1f   : > { %s2891_s14 = scalar_lea.vmem %s3257_s1, %s2217_s8  ;;  %s2280_s10 = sshll.u32 %s343_s17, 4 }
  0x20   : > { %s2896_s19 = scalar_lea.vmem %s3259_s3, %s2280_s10  ;;  %s2281_s18 = sshll.u32 %s343_s17, 5 }
  0x21   : > { %s2901_s30 = scalar_lea.vmem %s3260_s4, %s2281_s18  ;;  %s2906_s11 = scalar_lea.vmem %s3261_s5, %s2280_s10 }
  0x22   : > { %374 = sbr.rel (%p2226_p0) target bundleno = 41 (0x29), region = 48 }
  0x27   : > { %v375_v0 = vld [vmem:[%s341_s29] sm:$0xff]  ;;  %vm376_vm0 = vcmask 261120  }
  0x28   : > { %377 = vst.msk [vmem:[%s2908_s23] sm:$0xff] %vm376_vm0, %v375_v0 }
  0x29 PF: > { %v2606_v1 = vld [vmem:[%s2886_s26 + $0x8] sm:$0xff]   ;;  %v2760_v2 = vmov 0.0   ;;  %v2607_v3 = vld [vmem:[%s2886_s26 + $0x18] sm:$0xff]   ;;  %v2608_v4 = vld [vmem:[%s2886_s26] sm:$0xff]   ;;  %vm2761_vm1 = vmmov 0   ;;  %vm449_vm2 = vcmask 261120   ;;  %v426_v10 = vlaneseq }
  0x2a   : > { %2347 = vmatprep.subr.bf16.mxu0 %v2760_v2  ;;  %2355 = vmatprep.subr.bf16.mxu1 %v2760_v2  ;;  %v2609_v5 = vld [vmem:[%s2886_s26 + $0x10] sm:$0xff]   ;;  %v2610_v8 = vld [vmem:[%s2886_s26 + $0x28] sm:$0xff]   ;;  %v2611_v9 = vld [vmem:[%s2886_s26 + $0x20] sm:$0xff]   ;;  %s2762_s21 = smov 120   ;;  %vm647_vm3 = vcmask 64512   ;;  %s2763_s24 = smov 104  }
  0x2b   : > { %2348 = vmatpush3.bf16.msra.mxu0 %v2606_v1  ;;  %2351 = vmatprep.mubr.msk.bf16.mxu0 %vm2761_vm1, %v2760_v2  ;;  %v2945_v11 = vshrl.u32 %v426_v10, 7  ;;  %v2949_v13 = vld [vmem:[%s2906_s11] sm:$0xff]  ;;  %s2764_s28 = smov 112   ;;  %vm883_vm4 = vcmask 1043456   ;;  %v429_v54 = vand.u32 127, %v426_v10  ;;  %s2765_s8 = smov 8  }
  0x2c   : > { %2356 = vmatpush3.bf16.msra.mxu1 %v2607_v3  ;;  %2349 = vmatprep.subr.bf16.mxu0 %v2760_v2  ;;  %s2766_s10 = smov 16   ;;  %s2767_s13 = smov 24   ;;  %vm1078_vm6 = vcmask 130048   ;;  %vm1080_vm7 = vcmask 195584   ;;  %vm1990_vm8 = vcmask 523264  }
  0x2d   : > { %2357 = vmatprep.subr.bf16.mxu1 %v2760_v2  ;;  %2359 = vmatprep.mubr.msk.bf16.mxu1 %vm2761_vm1, %v2760_v2  ;;  %v435_v12 = vsub.s32 0, %v2945_v11  ;;  %v495_v14 = vsub.s32 1, %v2945_v11  ;;  %v551_v34 = vsub.s32 2, %v2945_v11  ;;  %vm430_vm5 = vcmp.gt.s32.totalorder %v429_v54, %v2945_v11  ;;  %s3283_s12 = sand.u32 1, %s2734_s22   ;;  %s2768_s16 = smov [#allocation2]  }
  0x2e   : > { %v431_v55 = vsel %vm430_vm5, -1e+09, %v2760_v2  ;;  %s2670_s20 = sshll.u32 %s2768_s16, 4  ;;  %s2671_s20 = int_to_ptr.vmem [resolvable:$false] %s2670_s20 }
  0x2f   : > { %v2925_v6 = vld [vmem:[%s2908_s23] sm:$0xff]  ;;  %2350 = vmatpush3.bf16.msra.mxu0 %v2608_v4  ;;  %v436_v15 = vrot.slane %v2949_v13, %v435_v12  ;;  %v496_v16 = vrot.slane %v2949_v13, %v495_v14  ;;  %v552_v38 = vrot.slane %v2949_v13, %v551_v34 }
  0x30   : > { %v432_v7 = vpack.c.bf16 %v2925_v6, %v2925_v6  ;;  %2358 = vmatpush3.bf16.msra.mxu1 %v2609_v5  ;;  %2363 = vmatprep.subr.bf16.mxu0 %v2760_v2 }
  0x31   : > { %2371 = vmatprep.subr.bf16.mxu1 %v2760_v2 }
  0x32   : > { %2352 = vmatmul.mubr.msk.bf16.vlgmr.msra.gmra.mxu0 %vm449_vm2, %v432_v7 }
  0x33   : > { %2360 = vmatmul.mubr.msk.bf16.vlgmr.msra.gmra.mxu1 %vm449_vm2, %v432_v7  ;;  %2367 = vmatprep.mubr.msk.bf16.mxu0 %vm2761_vm1, %v2760_v2 }
  0x34   : > { %2373 = vmatprep.mubr.msk.bf16.mxu1 %vm2761_vm1, %v2760_v2  ;;  %2364 = vmatpush3.bf16.msra.mxu0 %v2610_v8 }
  0x35   : > { %2365 = vmatprep.subr.bf16.mxu0 %v2760_v2 }
  0x38   : > { %2366 = vmatpush3.bf16.msra.mxu0 %v2611_v9 }
  0x39   : > { %2377 = vmatprep.subr.bf16.mxu0 %v2760_v2 }
  0x3b   : > { %2368 = vmatmul.mubr.msk.bf16.vlgmr.msra.gmra.mxu0 %vm449_vm2, %v432_v7 }
  0x3c   : > { %2379 = vmatprep.mubr.msk.bf16.mxu0 %vm2761_vm1, %v2760_v2 }
  0xf2   : > { %v487_v17 = vpop.f32.mrf.mxu0 }
  0xf3   : > { %v488_v18 = vadd.f32 %v487_v17, %v436_v15  ;;  %v543_v19 = vpop.f32.mrf.mxu1 }
  0xf4   : > { %v544_v20 = vadd.f32 %v543_v19, %v496_v16  ;;  %v2353_v21 = vpop.f32.mrf.mxu0 }
  0xf5   : > { %v2361_v22 = vpop.f32.mrf.mxu1  ;;  %606 = vrot.lane.b32.xlu1 %v488_v18, %s2762_s21  ;;  %v615_v29 = vpack.c.bf16 %v488_v18, %v488_v18 }
  0xf6   : > { %620 = vrot.lane.b32.xlu0 %v544_v20, %s2762_s21  ;;  %v490_v23 = vpop.f32.mrf.mxu0  ;;  %v629_v24 = vpack.c.bf16 %v544_v20, %v544_v20 }
  0xf7   : > { %v546_v25 = vpop.f32.mrf.mxu1 }
  0xf8   : > { %v2354_v26 = vpop.f32.mrf.mxu0  ;;  %v652_v27 = vsel %vm647_vm3, %v629_v24, 0 }
  0xf9   : > { %v2362_v28 = vpop.f32.mrf.mxu1  ;;  %2372 = vmatpush3.bf16.xpose.msra.mxu1 %v652_v27  ;;  %626 = vrot.lane.b32.xlu1 %v544_v20, %s2763_s24 }
  0xfa   : > { %623 = vrot.lane.b32.xlu0 %v544_v20, %s2764_s28  ;;  %2383 = vmatprep.subr.bf16.mxu1 %v2760_v2 }
  0xfb   : > { %v599_v30 = vpop.f32.mrf.mxu0 }
  0xfc   : > { %v2975_v43 = vadd.f32 %v599_v30, %v552_v38 }
  0xfd   : > { %612 = vrot.lane.b32.xlu1 %v488_v18, %s2763_s24  ;;  %v2369_v31 = vpop.f32.mrf.mxu0 }
  0xfe   : > { %609 = vrot.lane.b32.xlu0 %v488_v18, %s2764_s28  ;;  %v643_v47 = vpack.c.bf16 %v2975_v43, %v2975_v43 }
  0xff   : > { %v602_v32 = vpop.f32.mrf.mxu0 }
 0x100   : > { %2374 = vmatmul.mubr.msk.bf16.vlgmr.msra.gmra.mxu1 %vm647_vm3, %v615_v29  ;;  %v885_v51 = vsel %vm883_vm4, %v643_v47, 0 }
 0x101   : > { %2385 = vmatprep.mubr.msk.bf16.mxu1 %vm2761_vm1, %v2760_v2  ;;  %v2370_v33 = vpop.f32.mrf.mxu0 }
 0x167   : > { %v607_v35 = vpop.permute.xlu1 %606 }
 0x168   : > { %v621_v36 = vpop.permute.xlu0 %620  ;;  %v616_v46 = vpack.c.bf16 %v607_v35, %v607_v35 }
 0x169   : > { %v630_v37 = vpack.c.bf16 %v621_v36, %v621_v36 }
 0x16b   : > { %v698_v39 = vsel %vm647_vm3, %v630_v37, 0  ;;  %v627_v41 = vpop.permute.xlu1 %626 }
 0x16c   : > { %v624_v40 = vpop.permute.xlu0 %623  ;;  %2378 = vmatpush3.bf16.xpose.msra.mxu0 %v698_v39  ;;  %v632_v45 = vpack.c.bf16 %v627_v41, %v627_v41 }
 0x16d   : > { %v631_v42 = vpack.c.bf16 %v624_v40, %v624_v40  ;;  %2389 = vmatprep.subr.bf16.mxu0 %v2760_v2 }
 0x16e   : > { %v790_v49 = vsel %vm647_vm3, %v632_v45, 0 }
 0x16f   : > { %v744_v44 = vsel %vm647_vm3, %v631_v42, 0  ;;  %v613_v52 = vpop.permute.xlu1 %612 }
 0x170   : > { %2384 = vmatpush3.bf16.xpose.msra.mxu1 %v744_v44  ;;  %v610_v48 = vpop.permute.xlu0 %609  ;;  %v618_v53 = vpack.c.bf16 %v613_v52, %v613_v52 }
 0x171   : > { %2395 = vmatprep.subr.bf16.mxu1 %v2760_v2  ;;  %v617_v50 = vpack.c.bf16 %v610_v48, %v610_v48 }
 0x173   : > { %2380 = vmatmul.mubr.msk.bf16.vlgmr.msra.gmra.mxu0 %vm647_vm3, %v616_v46 }
 0x174   : > { %2390 = vmatpush3.bf16.xpose.msra.mxu0 %v790_v49  ;;  %2391 = vmatprep.mubr.msk.bf16.mxu0 %vm2761_vm1, %v2760_v2 }
 0x175   : > { %2401 = vmatprep.subr.bf16.mxu0 %v2760_v2 }
 0x177   : > { %2386 = vmatmul.mubr.msk.bf16.vlgmr.msra.gmra.mxu1 %vm647_vm3, %v617_v50 }
 0x178   : > { %2396 = vmatpush3.bf16.msra.mxu1 %v885_v51  ;;  %2397 = vmatprep.mubr.msk.bf16.mxu1 %vm2761_vm1, %v2760_v2 }
 0x179   : > { %2407 = vmatprep.subr.bf16.mxu1 %v2760_v2 }
 0x17b   : > { %2392 = vmatmul.mubr.msk.bf16.vlgmr.msra.gmra.mxu0 %vm647_vm3, %v618_v53 }
 0x17c   : > { %2403 = vmatprep.mubr.msk.bf16.mxu0 %vm2761_vm1, %v2760_v2 }
 0x1c0   : > { %v688_v56 = vpop.f32.mrf.mxu1 }
 0x1c1   : > { %v689_v57 = vadd.f32 %v688_v56, %v431_v55 }
 0x1c2   : > { %v2375_v58 = vpop.f32.mrf.mxu1 }
 0x1c3   : > { %v832_v59 = vsel %vm647_vm3, %v689_v57, -inf }
 0x1c4   : > { %833 = vmax.xlane.f32.xlu0 %v832_v59  ;;  %v691_v60 = vpop.f32.mrf.mxu1 }
 0x1c6   : > { %v2376_v61 = vpop.f32.mrf.mxu1 }
 0x233   : > { %v734_v62 = vpop.f32.mrf.mxu0 }
 0x234   : > { %v735_v63 = vadd.f32 %v734_v62, %v431_v55 }
 0x235   : > { %v2381_v0 = vpop.f32.mrf.mxu0 }
 0x236   : > { %v835_v1 = vsel %vm647_vm3, %v735_v63, -inf }
 0x237   : > { %v780_v3 = vpop.f32.mrf.mxu1  ;;  %836 = vmax.xlane.f32.xlu1 %v835_v1  ;;  %v737_v4 = vpop.f32.mrf.mxu0 }
 0x238   : > { %v781_v5 = vadd.f32 %v780_v3, %v431_v55 }
 0x239   : > { %v2382_v7 = vpop.f32.mrf.mxu0  ;;  %v2387_v8 = vpop.f32.mrf.mxu1 }
 0x23a   : > { %v838_v9 = vsel %vm647_vm3, %v781_v5, -inf }
 0x23b   : > { %839 = vmax.xlane.f32.xlu0 %v838_v9  ;;  %v783_v10 = vpop.f32.mrf.mxu1  ;;  %v826_v15 = vpop.f32.mrf.mxu0 }
 0x23c   : > { %v827_v16 = vadd.f32 %v826_v15, %v431_v55  ;;  %v2612_v10 = vld [vmem:[%s2886_s26 + $0x38] sm:$0xff]   ;;  %v2613_v15 = vld [vmem:[%s2886_s26 + $0x30] sm:$0xff]  }
 0x23d   : > { %v2388_v17 = vpop.f32.mrf.mxu1  ;;  %v2393_v18 = vpop.f32.mrf.mxu0 }
 0x23e   : > { %v841_v19 = vsel %vm647_vm3, %v827_v16, -inf }
 0x23f   : > { %842 = vmax.xlane.f32.xlu0 %v841_v19  ;;  %v829_v20 = vpop.f32.mrf.mxu0 }
 0x241   : > { %v2394_v21 = vpop.f32.mrf.mxu0 }
 0x248   : > { %634 = vrot.lane.b32.xlu1 %v2975_v43, %s2762_s21 }
 0x24d   : > { %v834_v22 = vpop.xlane.xlu0 %833 }
 0x24e   : > { %v844_v23 = vsub.f32 %v689_v57, %v834_v22 }
 0x250   : > { %v848_v24 = vmul.f32 1.442695, %v844_v23 }
 0x252   : > { %2628 = vpow2.f32 %v848_v24 }
 0x25f   : > { %v2629_v25 = vpop.eup %2628 }
 0x260   : > { %v856_v26 = vsel %vm647_vm3, %v2629_v25, 0.0 }
 0x26c   : > { %857 = vadd.xlane.f32.xlu1 %v856_v26 }
 0x2c0   : > { %v837_v27 = vpop.xlane.xlu1 %836 }
 0x2c1   : > { %v845_v28 = vsub.f32 %v735_v63, %v837_v27 }
 0x2c3   : > { %v850_v29 = vmul.f32 1.442695, %v845_v28 }
 0x2c4   : > { %v840_v30 = vpop.xlane.xlu0 %839  ;;  %v635_v31 = vpop.permute.xlu1 %634 }
 0x2c5   : > { %2630 = vpow2.f32 %v850_v29  ;;  %v846_v32 = vsub.f32 %v781_v5, %v840_v30  ;;  %v644_v33 = vpack.c.bf16 %v635_v31, %v635_v31 }
 0x2c7   : > { %v852_v35 = vmul.f32 1.442695, %v846_v32  ;;  %v931_v36 = vsel %vm883_vm4, %v644_v33, 0 }
 0x2c8   : > { %2402 = vmatpush3.bf16.msra.mxu0 %v931_v36  ;;  %v843_v37 = vpop.xlane.xlu0 %842  ;;  %v1085_v36 = vsub.s32 3, %v2945_v11 }
 0x2c9   : > { %2632 = vpow2.f32 %v852_v35  ;;  %v847_v38 = vsub.f32 %v827_v16, %v843_v37  ;;  %2413 = vmatprep.subr.bf16.mxu0 %v2760_v2 }
 0x2ca   : > { %v1086_v37 = vrot.slane %v2949_v13, %v1085_v36 }
 0x2cb   : > { %v854_v39 = vmul.f32 1.442695, %v847_v38 }
 0x2cd   : > { %2634 = vpow2.f32 %v854_v39 }
 0x2d2   : > { %v2631_v40 = vpop.eup %2630 }
 0x2d3   : > { %v859_v41 = vsel %vm647_vm3, %v2631_v40, 0.0 }
 0x2d4   : > { %860 = vadd.xlane.f32.xlu0 %v859_v41 }
 0x2d6   : > { %v2633_v42 = vpop.eup %2632 }
 0x2d7   : > { %v862_v44 = vsel %vm647_vm3, %v2633_v42, 0.0 }
 0x2d8   : > { %863 = vadd.xlane.f32.xlu1 %v862_v44 }
 0x2da   : > { %v2635_v45 = vpop.eup %2634 }
 0x2db   : > { %v865_v46 = vsel %vm647_vm3, %v2635_v45, 0.0 }
 0x2dc   : > { %866 = vadd.xlane.f32.xlu0 %v865_v46 }
 0x2e9   : > { %640 = vrot.lane.b32.xlu1 %v2975_v43, %s2763_s24 }
 0x2f2   : > { %637 = vrot.lane.b32.xlu0 %v2975_v43, %s2764_s28 }
 0x2f5   : > { %v858_v47 = vpop.xlane.xlu1 %857 }
 0x2f6   : > { %2636 = vrcp.f32 %v858_v47 }
 0x303   : > { %v2637_v48 = vpop.eup %2636 }
 0x304   : > { %v872_v49 = vmul.f32 %v2637_v48, %v2629_v25 }
 0x306   : > { %v876_v50 = vpack.c.bf16 %v872_v49, %v872_v49 }
 0x308   : > { %2398 = vmatmul.mubr.msk.bf16.vlgmr.msra.gmra.mxu1 %vm647_vm3, %v876_v50 }
 0x309   : > { %2409 = vmatprep.mubr.msk.bf16.mxu1 %vm2761_vm1, %v2760_v2 }
 0x35d   : > { %v861_v51 = vpop.xlane.xlu0 %860 }
 0x35e   : > { %2638 = vrcp.f32 %v861_v51  ;;  %v2614_v51 = vld [vmem:[%s2886_s26 + $0x58] sm:$0xff]  }
 0x361   : > { %v864_v52 = vpop.xlane.xlu1 %863 }
 0x362   : > { %2640 = vrcp.f32 %v864_v52  ;;  %v379_v52 = vld [vmem:[%s2891_s14] sm:$0xff]  ;;  %s2073_s14 = sshll.u32 %s2908_s23, 4  ;;  %s2074_s14 = int_to_ptr.vmem [resolvable:$true] %s2073_s14 }
 0x363   : > { %s2666_s18 = scalar_lea.vmem %s2074_s14, 128  ;;  %p2673_p5 = scmp.lt.s32.totalorder %s2074_s14, %s2671_s20 }
 0x364   : > { %p2667_p1 = scmp.ne.s32.totalorder %s2074_s14, %s2666_s18 }
 0x365   : > { %v867_v53 = vpop.xlane.xlu0 %866  ;;  %v641_v54 = vpop.permute.xlu1 %640 }
 0x366   : > { %2642 = vrcp.f32 %v867_v53  ;;  %v646_v57 = vpack.c.bf16 %v641_v54, %v641_v54  ;;  %v1168_v53 = vpack.c.bf16 %v379_v52, %v379_v52  ;;  %v2616_v54 = vld [vmem:[%s2886_s26 + $0x48] sm:$0xff]   ;;  %p2668_p2 = pnand %p2667_p1, %p2853_p3 }
 0x368   : > { %v1023_v62 = vsel %vm883_vm4, %v646_v57, 0  ;;  %p2669_p4 = pneg %p2668_p2 }
 0x369   : > { %v638_v55 = vpop.permute.xlu0 %637 }
 0x36a   : > { %v645_v56 = vpack.c.bf16 %v638_v55, %v638_v55  ;;  %v2617_v55 = vld [vmem:[%s2886_s26 + $0x40] sm:$0xff]  }
 0x36b   : > { %v2639_v43 = vpop.eup %2638 }
 0x36c   : > { %v977_v58 = vsel %vm883_vm4, %v645_v56, 0  ;;  %v873_v59 = vmul.f32 %v2639_v43, %v2631_v40 }
 0x36d   : > { %2408 = vmatpush3.bf16.msra.mxu1 %v977_v58  ;;  %v3062_v58 = vld [vmem:[%s2906_s11 + $0x8] sm:$0xff] }
 0x36e   : > { %v877_v60 = vpack.c.bf16 %v873_v59, %v873_v59  ;;  %2419 = vmatprep.subr.bf16.mxu1 %v2760_v2  ;;  %v1160_v59 = vrot.slane %v3062_v58, %v495_v14  ;;  %v1230_v14 = vsub.s32 5, %v2945_v11 }
 0x36f   : > { %v2641_v61 = vpop.eup %2640 }
 0x370   : > { %2404 = vmatmul.mubr.msk.bf16.vlgmr.msra.gmra.mxu0 %vm647_vm3, %v877_v60  ;;  %v874_v63 = vmul.f32 %v2641_v61, %v2633_v42  ;;  %v1165_v61 = vrot.slane %v3062_v58, %v551_v34  ;;  %v1231_v34 = vrot.slane %v2949_v13, %v1230_v14 }
 0x371   : > { %2414 = vmatpush3.bf16.msra.mxu0 %v1023_v62  ;;  %2415 = vmatprep.mubr.msk.bf16.mxu0 %vm2761_vm1, %v2760_v2 }
 0x372   : > { %v878_v0 = vpack.c.bf16 %v874_v63, %v874_v63  ;;  %2427 = vmatprep.subr.bf16.mxu0 %v2760_v2 }
 0x373   : > { %v2643_v1 = vpop.eup %2642 }
 0x374   : > { %2410 = vmatmul.mubr.msk.bf16.vlgmr.msra.gmra.mxu1 %vm647_vm3, %v878_v0  ;;  %v875_v3 = vmul.f32 %v2643_v1, %v2635_v45 }
 0x375   : > { %2423 = vmatprep.mubr.msk.bf16.mxu1 %vm2761_vm1, %v2760_v2  ;;  %2420 = vmatpush3.bf16.msra.mxu1 %v2612_v10 }
 0x376   : > { %v879_v4 = vpack.c.bf16 %v875_v3, %v875_v3  ;;  %2421 = vmatprep.subr.bf16.mxu1 %v2760_v2 }
 0x378   : > { %2416 = vmatmul.mubr.msk.bf16.vlgmr.msra.gmra.mxu0 %vm647_vm3, %v879_v4 }
 0x379   : > { %2431 = vmatprep.mubr.msk.bf16.mxu0 %vm2761_vm1, %v2760_v2  ;;  %2422 = vmatpush3.bf16.msra.mxu1 %v2613_v15  ;;  %v2618_v15 = vld [vmem:[%s2886_s26 + $0x68] sm:$0xff]  }
 0x37a   : > { %2435 = vmatprep.subr.bf16.mxu1 %v2760_v2  ;;  %2428 = vmatpush3.bf16.msra.mxu0 %v2616_v54 }
 0x37b   : > { %2429 = vmatprep.subr.bf16.mxu0 %v2760_v2 }
 0x37e   : > { %2430 = vmatpush3.bf16.msra.mxu0 %v2617_v55 }
 0x37f   : > { %2443 = vmatprep.subr.bf16.mxu0 %v2760_v2 }
 0x3c8   : > { %v921_v5 = vpop.f32.mrf.mxu1 }
 0x3ca   : > { %v2399_v7 = vpop.f32.mrf.mxu1 }
 0x3cc   : > { %v924_v8 = vpop.f32.mrf.mxu1 }
 0x3ce   : > { %v2400_v9 = vpop.f32.mrf.mxu1 }
 0x430   : > { %v967_v16 = vpop.f32.mrf.mxu0 }
 0x431   : > { %1066 = vrot.lane.b32.xlu1 %v967_v16, %s2765_s8  ;;  %v2619_v16 = vld [vmem:[%s2886_s26 + $0x60] sm:$0xff]  }
 0x432   : > { %v2405_v17 = vpop.f32.mrf.mxu0 }
 0x434   : > { %v970_v18 = vpop.f32.mrf.mxu0  ;;  %v1013_v19 = vpop.f32.mrf.mxu1 }
 0x435   : > { %1070 = vrot.lane.b32.xlu0 %v1013_v19, %s2766_s10 }
 0x436   : > { %v2406_v20 = vpop.f32.mrf.mxu0  ;;  %v2411_v21 = vpop.f32.mrf.mxu1 }
 0x437   : > { %v1171_v20 = vsub.s32 4, %v2945_v11 }
 0x438   : > { %v1016_v22 = vpop.f32.mrf.mxu1  ;;  %v1059_v23 = vpop.f32.mrf.mxu0 }
 0x439   : > { %1074 = vrot.lane.b32.xlu1 %v1059_v23, %s2767_s13  ;;  %v1172_v21 = vrot.slane %v2949_v13, %v1171_v20 }
 0x43a   : > { %v2412_v24 = vpop.f32.mrf.mxu1  ;;  %v2417_v25 = vpop.f32.mrf.mxu0 }
 0x43c   : > { %v1062_v26 = vpop.f32.mrf.mxu0 }
 0x43e   : > { %v2418_v27 = vpop.f32.mrf.mxu0 }
 0x4a3   : > { %v1067_v28 = vpop.permute.xlu1 %1066 }
 0x4a4   : > { %v1077_v30 = vsel %vm647_vm3, %v921_v5, %v1067_v28 }
 0x4a7   : > { %v1071_v29 = vpop.permute.xlu0 %1070 }
 0x4a8   : > { %v1079_v31 = vsel %vm1078_vm6, %v1077_v30, %v1071_v29 }
 0x4ab   : > { %v1075_v32 = vpop.permute.xlu1 %1074 }
 0x4ac   : > { %v1081_v33 = vsel %vm1080_vm7, %v1079_v31, %v1075_v32 }
 0x4ad   : > { %v1082_v35 = vpack.c.bf16 %v1081_v33, %v1081_v33 }
 0x4af   : > { %2424 = vmatmul.mubr.msk.bf16.vlgmr.msra.gmra.mxu1 %vm449_vm2, %v1082_v35 }
 0x4b0   : > { %2439 = vmatprep.mubr.msk.bf16.mxu1 %vm2761_vm1, %v2760_v2  ;;  %2436 = vmatpush3.bf16.msra.mxu1 %v2614_v51 }
 0x4b1   : > { %2437 = vmatprep.subr.bf16.mxu1 %v2760_v2 }
 0x56f   : > { %v1136_v38 = vpop.f32.mrf.mxu1 }
 0x570   : > { %v1137_v39 = vadd.f32 %v1136_v38, %v1086_v37  ;;  %v1289_v37 = vsub.s32 6, %v2945_v11 }
 0x571   : > { %v2425_v40 = vpop.f32.mrf.mxu1 }
 0x572   : > { %v1142_v41 = vadd.f32 %v1137_v39, %v2925_v6  ;;  %v2615_v6 = vld [vmem:[%s2886_s26 + $0x50] sm:$0xff]   ;;  %v1290_v38 = vrot.slane %v2949_v13, %v1289_v37 }
 0x573   : > { %v1139_v42 = vpop.f32.mrf.mxu1  ;;  %2438 = vmatpush3.bf16.msra.mxu1 %v2615_v6 }
 0x574   : > { %v1143_v44 = vsel %vm449_vm2, %v1142_v41, 0.0  ;;  %2451 = vmatprep.subr.bf16.mxu1 %v2760_v2 }
 0x575   : > { %1144 = vadd.xlane.f32.xlu0 %v1143_v44  ;;  %v2426_v45 = vpop.f32.mrf.mxu1 }
 0x576   : > { %2440 = vmatmul.mubr.msk.bf16.vlgmr.msra.gmra.mxu1 %vm449_vm2, %v1168_v53 }
 0x577   : > { %2453 = vmatprep.mubr.msk.bf16.mxu1 %vm2761_vm1, %v2760_v2 }
 0x5fe   : > { %v1145_v46 = vpop.xlane.xlu0 %1144 }
 0x5ff   : > { %v1147_v47 = vmul.f32 0.03125, %v1145_v46 }
 0x601   : > { %v1148_v48 = vsub.f32 %v1142_v41, %v1147_v47 }
 0x603   : > { %v1149_v49 = vmul.f32 %v1148_v48, %v1148_v48 }
 0x605   : > { %v1150_v50 = vsel %vm449_vm2, %v1149_v49, 0.0 }
 0x606   : > { %1151 = vadd.xlane.f32.xlu1 %v1150_v50 }
 0x636   : > { %v1281_v3 = vpop.f32.mrf.mxu1 }
 0x637   : > { %v1282_v4 = vadd.f32 %v1281_v3, %v1231_v34 }
 0x638   : > { %v2441_v5 = vpop.f32.mrf.mxu1 }
 0x639   : > { %1361 = vrot.lane.b32.xlu1 %v1282_v4, %s2764_s28  ;;  %1358 = vrot.lane.b32.xlu0 %v1282_v4, %s2762_s21  ;;  %v1367_v7 = vpack.c.bf16 %v1282_v4, %v1282_v4 }
 0x63a   : > { %v1284_v8 = vpop.f32.mrf.mxu1 }
 0x63b   : > { %v1389_v9 = vsel %vm647_vm3, %v1367_v7, 0 }
 0x63c   : > { %v2442_v10 = vpop.f32.mrf.mxu1  ;;  %2452 = vmatpush3.bf16.xpose.msra.mxu1 %v1389_v9 }
 0x63d   : > { %1364 = vrot.lane.b32.xlu1 %v1282_v4, %s2763_s24  ;;  %2463 = vmatprep.subr.bf16.mxu1 %v2760_v2 }
 0x68f   : > { %v1152_v56 = vpop.xlane.xlu1 %1151 }
 0x690   : > { %v1153_v43 = vmul.f32 0.03125, %v1152_v56 }
 0x692   : > { %v1154_v57 = vadd.f32 1e-05, %v1153_v43 }
 0x694   : > { %2644 = vrsqrt.f32 %v1154_v57 }
 0x6a1   : > { %v2645_v60 = vpop.eup %2644 }
 0x6a2   : > { %v1156_v62 = vmul.f32 %v2645_v60, %v1148_v48 }
 0x6a4   : > { %v1161_v63 = vmul.f32 %v1160_v59, %v1156_v62 }
 0x6a6   : > { %v3070_v0 = vadd.f32 %v1165_v61, %v1161_v63 }
 0x6a8   : > { %v1167_v1 = vpack.c.bf16 %v3070_v0, %v3070_v0 }
 0x6aa   : > { %2432 = vmatmul.mubr.msk.bf16.vlgmr.msra.gmra.mxu0 %vm449_vm2, %v1167_v1 }
 0x6ab   : > { %2447 = vmatprep.mubr.msk.bf16.mxu0 %vm2761_vm1, %v2760_v2  ;;  %2444 = vmatpush3.bf16.msra.mxu0 %v2618_v15  ;;  %v1359_v17 = vpop.permute.xlu0 %1358  ;;  %v1362_v22 = vpop.permute.xlu1 %1361 }
 0x6ac   : > { %2445 = vmatprep.subr.bf16.mxu0 %v2760_v2  ;;  %v1368_v18 = vpack.c.bf16 %v1359_v17, %v1359_v17  ;;  %v1369_v23 = vpack.c.bf16 %v1362_v22, %v1362_v22 }
 0x6ae   : > { %v1435_v19 = vsel %vm647_vm3, %v1368_v18, 0  ;;  %v1481_v28 = vsel %vm647_vm3, %v1369_v23, 0 }
 0x6af   : > { %2446 = vmatpush3.bf16.msra.mxu0 %v2619_v16  ;;  %v1365_v39 = vpop.permute.xlu1 %1364 }
 0x6b0   : > { %2457 = vmatprep.subr.bf16.mxu0 %v2760_v2  ;;  %v1370_v41 = vpack.c.bf16 %v1365_v39, %v1365_v39 }
 0x6b2   : > { %2448 = vmatmul.mubr.msk.bf16.vlgmr.msra.gmra.mxu0 %vm449_vm2, %v1168_v53  ;;  %v1527_v46 = vsel %vm647_vm3, %v1370_v41, 0 }
 0x6b3   : > { %2459 = vmatprep.mubr.msk.bf16.mxu0 %vm2761_vm1, %v2760_v2  ;;  %2458 = vmatpush3.bf16.xpose.msra.mxu0 %v1435_v19 }
 0x6b4   : > { %2469 = vmatprep.subr.bf16.mxu0 %v2760_v2 }
 0x76a   : > { %v1222_v24 = vpop.f32.mrf.mxu0 }
 0x76b   : > { %v1223_v25 = vadd.f32 %v1222_v24, %v1172_v21 }
 0x76c   : > { %v2433_v26 = vpop.f32.mrf.mxu0 }
 0x76d   : > { %v1353_v27 = vpack.c.bf16 %v1223_v25, %v1223_v25  ;;  %1350 = vrot.lane.b32.xlu1 %v1223_v25, %s2763_s24  ;;  %1344 = vrot.lane.b32.xlu0 %v1223_v25, %s2762_s21 }
 0x76e   : > { %v1225_v29 = vpop.f32.mrf.mxu0 }
 0x76f   : > { %2454 = vmatmul.mubr.msk.bf16.vlgmr.msra.gmra.mxu1 %vm647_vm3, %v1353_v27 }
 0x770   : > { %v2434_v30 = vpop.f32.mrf.mxu0  ;;  %2464 = vmatpush3.bf16.xpose.msra.mxu1 %v1481_v28  ;;  %2465 = vmatprep.mubr.msk.bf16.mxu1 %vm2761_vm1, %v2760_v2 }
 0x771   : > { %1347 = vrot.lane.b32.xlu0 %v1223_v25, %s2764_s28  ;;  %2475 = vmatprep.subr.bf16.mxu1 %v2760_v2 }
 0x772   : > { %v1337_v31 = vpop.f32.mrf.mxu0 }
 0x773   : > { %v3111_v40 = vadd.f32 %v1337_v31, %v1290_v38 }
 0x774   : > { %v2449_v32 = vpop.f32.mrf.mxu0 }
 0x775   : > { %v1381_v45 = vpack.c.bf16 %v3111_v40, %v3111_v40 }
 0x776   : > { %v1340_v33 = vpop.f32.mrf.mxu0 }
 0x777   : > { %v1621_v49 = vsel %vm883_vm4, %v1381_v45, 0 }
 0x778   : > { %v2450_v35 = vpop.f32.mrf.mxu0 }
 0x7df   : > { %v1345_v42 = vpop.permute.xlu0 %1344  ;;  %v1351_v50 = vpop.permute.xlu1 %1350 }
 0x7e0   : > { %v1354_v44 = vpack.c.bf16 %v1345_v42, %v1345_v42  ;;  %v1356_v51 = vpack.c.bf16 %v1351_v50, %v1351_v50 }
 0x7e2   : > { %2460 = vmatmul.mubr.msk.bf16.vlgmr.msra.gmra.mxu0 %vm647_vm3, %v1354_v44 }
 0x7e3   : > { %2470 = vmatpush3.bf16.xpose.msra.mxu0 %v1527_v46  ;;  %v1348_v47 = vpop.permute.xlu0 %1347  ;;  %2471 = vmatprep.mubr.msk.bf16.mxu0 %vm2761_vm1, %v2760_v2 }
 0x7e4   : > { %v1355_v48 = vpack.c.bf16 %v1348_v47, %v1348_v47  ;;  %2481 = vmatprep.subr.bf16.mxu0 %v2760_v2 }
 0x7e6   : > { %2466 = vmatmul.mubr.msk.bf16.vlgmr.msra.gmra.mxu1 %vm647_vm3, %v1355_v48 }
 0x7e7   : > { %2476 = vmatpush3.bf16.msra.mxu1 %v1621_v49  ;;  %2477 = vmatprep.mubr.msk.bf16.mxu1 %vm2761_vm1, %v2760_v2 }
 0x7e8   : > { %2487 = vmatprep.subr.bf16.mxu1 %v2760_v2 }
 0x7ea   : > { %2472 = vmatmul.mubr.msk.bf16.vlgmr.msra.gmra.mxu0 %vm647_vm3, %v1356_v51 }
 0x7eb   : > { %2483 = vmatprep.mubr.msk.bf16.mxu0 %vm2761_vm1, %v2760_v2 }
 0x82f   : > { %v1425_v6 = vpop.f32.mrf.mxu1 }
 0x830   : > { %v1569_v52 = vsel %vm647_vm3, %v1425_v6, -inf }
 0x831   : > { %1570 = vmax.xlane.f32.xlu0 %v1569_v52  ;;  %v2455_v53 = vpop.f32.mrf.mxu1 }
 0x833   : > { %v1428_v54 = vpop.f32.mrf.mxu1 }
 0x835   : > { %v2456_v55 = vpop.f32.mrf.mxu1 }
 0x8a2   : > { %v1471_v56 = vpop.f32.mrf.mxu0 }
 0x8a3   : > { %v1572_v43 = vsel %vm647_vm3, %v1471_v56, -inf }
 0x8a4   : > { %1573 = vmax.xlane.f32.xlu1 %v1572_v43  ;;  %v2461_v57 = vpop.f32.mrf.mxu0 }
 0x8a6   : > { %v1474_v59 = vpop.f32.mrf.mxu0  ;;  %v1517_v60 = vpop.f32.mrf.mxu1 }
 0x8a7   : > { %v1575_v61 = vsel %vm647_vm3, %v1517_v60, -inf }
 0x8a8   : > { %1576 = vmax.xlane.f32.xlu0 %v1575_v61  ;;  %v2462_v62 = vpop.f32.mrf.mxu0  ;;  %v2467_v63 = vpop.f32.mrf.mxu1 }
 0x8aa   : > { %v1520_v1 = vpop.f32.mrf.mxu1  ;;  %v1563_v34 = vpop.f32.mrf.mxu0 }
 0x8ab   : > { %v1578_v3 = vsel %vm647_vm3, %v1563_v34, -inf }
 0x8ac   : > { %v2468_v4 = vpop.f32.mrf.mxu1  ;;  %1579 = vmax.xlane.f32.xlu0 %v1578_v3  ;;  %v2473_v5 = vpop.f32.mrf.mxu0  ;;  %v2620_v3 = vld [vmem:[%s2886_s26 + $0x78] sm:$0xff]  }
 0x8ad   : > { %v2621_v4 = vld [vmem:[%s2886_s26 + $0x70] sm:$0xff]   ;;  %s2276_s26 = sshll.u32 %s2746_s25, 7  ;;  %s2672_s25 = scalar_lea.vmem %s2671_s20, 256 }
 0x8ae   : > { %v1566_v7 = vpop.f32.mrf.mxu0  ;;  %s2071_s29 = scalar_lea.hbm %s3262_s6, %s2276_s26  ;;  %p2674_p6 = scmp.lt.s32.totalorder %s2672_s25, %s2666_s18 }
 0x8b0   : > { %v2474_v8 = vpop.f32.mrf.mxu0  ;;  %p2675_p7 = por %p2674_p6, %p2673_p5 }
 0x8b2   : > { %p2676_p8 = pnand %p2675_p7, %p2669_p4 }
 0x8b5   : > { %1372 = vrot.lane.b32.xlu1 %v3111_v40, %s2762_s21 }
 0x8ba   : > { %v1571_v9 = vpop.xlane.xlu0 %1570 }
 0x8bb   : > { %v1581_v10 = vsub.f32 %v1425_v6, %v1571_v9 }
 0x8bd   : > { %v1585_v15 = vmul.f32 1.442695, %v1581_v10 }
 0x8bf   : > { %2646 = vpow2.f32 %v1585_v15 }
 0x8cc   : > { %v2647_v16 = vpop.eup %2646 }
 0x8cd   : > { %v1593_v17 = vsel %vm647_vm3, %v2647_v16, 0.0 }
 0x8d9   : > { %1594 = vadd.xlane.f32.xlu1 %v1593_v17 }
 0x92d   : > { %v1574_v18 = vpop.xlane.xlu1 %1573 }
 0x92e   : > { %v1582_v19 = vsub.f32 %v1471_v56, %v1574_v18 }
 0x930   : > { %v1587_v21 = vmul.f32 1.442695, %v1582_v19 }
 0x931   : > { %v1577_v22 = vpop.xlane.xlu0 %1576  ;;  %v1373_v23 = vpop.permute.xlu1 %1372 }
 0x932   : > { %2648 = vpow2.f32 %v1587_v21  ;;  %v1583_v24 = vsub.f32 %v1517_v60, %v1577_v22  ;;  %v1382_v25 = vpack.c.bf16 %v1373_v23, %v1373_v23 }
 0x934   : > { %v1589_v26 = vmul.f32 1.442695, %v1583_v24  ;;  %v1667_v27 = vsel %vm883_vm4, %v1382_v25, 0 }
 0x935   : > { %2482 = vmatpush3.bf16.msra.mxu0 %v1667_v27  ;;  %v1580_v28 = vpop.xlane.xlu0 %1579 }
 0x936   : > { %2650 = vpow2.f32 %v1589_v26  ;;  %v1584_v29 = vsub.f32 %v1563_v34, %v1580_v28  ;;  %2493 = vmatprep.subr.bf16.mxu0 %v2760_v2 }
 0x938   : > { %v1591_v30 = vmul.f32 1.442695, %v1584_v29 }
 0x93a   : > { %2652 = vpow2.f32 %v1591_v30  ;;  %v1819_v30 = vsub.s32 7, %v2945_v11 }
 0x93f   : > { %v2649_v31 = vpop.eup %2648 }
 0x940   : > { %v1596_v32 = vsel %vm647_vm3, %v2649_v31, 0.0 }
 0x941   : > { %1597 = vadd.xlane.f32.xlu0 %v1596_v32 }
 0x943   : > { %v2651_v33 = vpop.eup %2650 }
 0x944   : > { %v1599_v35 = vsel %vm647_vm3, %v2651_v33, 0.0 }
 0x945   : > { %1600 = vadd.xlane.f32.xlu1 %v1599_v35 }
 0x947   : > { %v2653_v38 = vpop.eup %2652 }
 0x948   : > { %v1602_v39 = vsel %vm647_vm3, %v2653_v38, 0.0 }
 0x949   : > { %1603 = vadd.xlane.f32.xlu0 %v1602_v39 }
 0x956   : > { %1378 = vrot.lane.b32.xlu1 %v3111_v40, %s2763_s24 }
 0x95f   : > { %1375 = vrot.lane.b32.xlu0 %v3111_v40, %s2764_s28 }
 0x962   : > { %v1595_v41 = vpop.xlane.xlu1 %1594 }
 0x963   : > { %2654 = vrcp.f32 %v1595_v41 }
 0x970   : > { %v2655_v42 = vpop.eup %2654 }
 0x971   : > { %v1609_v44 = vmul.f32 %v2655_v42, %v2647_v16 }
 0x973   : > { %v1613_v45 = vpack.c.bf16 %v1609_v44, %v1609_v44 }
 0x975   : > { %2478 = vmatmul.mubr.msk.bf16.vlgmr.msra.gmra.mxu1 %vm647_vm3, %v1613_v45 }
 0x976   : > { %2489 = vmatprep.mubr.msk.bf16.mxu1 %vm2761_vm1, %v2760_v2 }
 0x9ca   : > { %v1598_v46 = vpop.xlane.xlu0 %1597 }
 0x9cb   : > { %2656 = vrcp.f32 %v1598_v46 }
 0x9ce   : > { %v1601_v47 = vpop.xlane.xlu1 %1600 }
 0x9cf   : > { %2658 = vrcp.f32 %v1601_v47 }
 0x9d2   : > { %v1604_v48 = vpop.xlane.xlu0 %1603  ;;  %v1379_v49 = vpop.permute.xlu1 %1378 }
 0x9d3   : > { %2660 = vrcp.f32 %v1604_v48  ;;  %v1384_v6 = vpack.c.bf16 %v1379_v49, %v1379_v49  ;;  %v2623_v49 = vld [vmem:[%s2896_s19] sm:$0xff]  }
 0x9d5   : > { %v1759_v56 = vsel %vm883_vm4, %v1384_v6, 0 }
 0x9d6   : > { %v1376_v50 = vpop.permute.xlu0 %1375 }
 0x9d7   : > { %v1383_v51 = vpack.c.bf16 %v1376_v50, %v1376_v50  ;;  %v2625_v50 = vld [vmem:[%s2901_s30 + $0x10] sm:$0xff]  }
 0x9d8   : > { %v2657_v40 = vpop.eup %2656 }
 0x9d9   : > { %v1713_v52 = vsel %vm883_vm4, %v1383_v51, 0  ;;  %v1610_v53 = vmul.f32 %v2657_v40, %v2649_v31  ;;  %v1820_v31 = vrot.slane %v2949_v13, %v1819_v30  ;;  %v2622_v13 = vld [vmem:[%s2896_s19 + $0x8] sm:$0xff]   ;;  %s2060_s19 = scalar_lea.sflag [#allocation3], %s3283_s12 }
 0x9da   : > { %2488 = vmatpush3.bf16.msra.mxu1 %v1713_v52  ;;  %v1893_v52 = vrot.slane %v3062_v58, %v1085_v36 }
 0x9db   : > { %v1614_v54 = vpack.c.bf16 %v1610_v53, %v1610_v53  ;;  %2499 = vmatprep.subr.bf16.mxu1 %v2760_v2 }
 0x9dc   : > { %v2659_v55 = vpop.eup %2658 }
 0x9dd   : > { %2484 = vmatmul.mubr.msk.bf16.vlgmr.msra.gmra.mxu0 %vm647_vm3, %v1614_v54  ;;  %v1611_v43 = vmul.f32 %v2659_v55, %v2651_v33  ;;  %v1898_v54 = vrot.slane %v3062_v58, %v1171_v20 }
 0x9de   : > { %2494 = vmatpush3.bf16.msra.mxu0 %v1759_v56  ;;  %2495 = vmatprep.mubr.msk.bf16.mxu0 %vm2761_vm1, %v2760_v2 }
 0x9df   : > { %v1615_v57 = vpack.c.bf16 %v1611_v43, %v1611_v43  ;;  %2507 = vmatprep.subr.bf16.mxu0 %v2760_v2 }
 0x9e0   : > { %v2661_v59 = vpop.eup %2660 }
 0x9e1   : > { %2490 = vmatmul.mubr.msk.bf16.vlgmr.msra.gmra.mxu1 %vm647_vm3, %v1615_v57  ;;  %v1612_v60 = vmul.f32 %v2661_v59, %v2653_v38  ;;  %v2626_v59 = vld [vmem:[%s2901_s30 + $0x8] sm:$0xff]  }
 0x9e2   : > { %2503 = vmatprep.mubr.msk.bf16.mxu1 %vm2761_vm1, %v2760_v2  ;;  %2500 = vmatpush3.bf16.msra.mxu1 %v2620_v3 }
 0x9e3   : > { %v1616_v61 = vpack.c.bf16 %v1612_v60, %v1612_v60  ;;  %2501 = vmatprep.subr.bf16.mxu1 %v2760_v2  ;;  %v2627_v60 = vld [vmem:[%s2901_s30] sm:$0xff]  }
 0x9e5   : > { %2496 = vmatmul.mubr.msk.bf16.vlgmr.msra.gmra.mxu0 %vm647_vm3, %v1616_v61  ;;  %v1904_v61 = vrot.slane %v3062_v58, %v1819_v30 }
 0x9e6   : > { %2511 = vmatprep.mubr.msk.bf16.mxu0 %vm2761_vm1, %v2760_v2  ;;  %2502 = vmatpush3.bf16.msra.mxu1 %v2621_v4  ;;  %v1965_v4 = vrot.slane %v3062_v58, %v435_v12 }
 0x9e7   : > { %2515 = vmatprep.subr.bf16.mxu1 %v2760_v2  ;;  %2508 = vmatpush3.bf16.msra.mxu0 %v2622_v13 }
 0x9e8   : > { %2509 = vmatprep.subr.bf16.mxu0 %v2760_v2 }
 0x9eb   : > { %2510 = vmatpush3.bf16.msra.mxu0 %v2623_v49 }
 0xa35   : > { %v1657_v62 = vpop.f32.mrf.mxu1 }
 0xa37   : > { %v2479_v63 = vpop.f32.mrf.mxu1 }
 0xa39   : > { %v1660_v1 = vpop.f32.mrf.mxu1 }
 0xa3b   : > { %v2480_v34 = vpop.f32.mrf.mxu1 }
 0xa9d   : > { %v1703_v5 = vpop.f32.mrf.mxu0 }
 0xa9e   : > { %1802 = vrot.lane.b32.xlu1 %v1703_v5, %s2765_s8 }
 0xa9f   : > { %v2485_v7 = vpop.f32.mrf.mxu0 }
 0xaa1   : > { %v1706_v8 = vpop.f32.mrf.mxu0  ;;  %v1749_v9 = vpop.f32.mrf.mxu1 }
 0xaa2   : > { %1806 = vrot.lane.b32.xlu0 %v1749_v9, %s2766_s10 }
 0xaa3   : > { %v2486_v10 = vpop.f32.mrf.mxu0  ;;  %v2491_v15 = vpop.f32.mrf.mxu1 }
 0xaa5   : > { %v1752_v16 = vpop.f32.mrf.mxu1  ;;  %v1795_v17 = vpop.f32.mrf.mxu0 }
 0xaa6   : > { %1810 = vrot.lane.b32.xlu1 %v1795_v17, %s2767_s13 }
 0xaa7   : > { %v2492_v18 = vpop.f32.mrf.mxu1  ;;  %v2497_v19 = vpop.f32.mrf.mxu0 }
 0xaa9   : > { %v1798_v21 = vpop.f32.mrf.mxu0 }
 0xaab   : > { %v2498_v22 = vpop.f32.mrf.mxu0 }
 0xb10   : > { %v1803_v23 = vpop.permute.xlu1 %1802 }
 0xb11   : > { %v1813_v25 = vsel %vm647_vm3, %v1657_v62, %v1803_v23 }
 0xb14   : > { %v1807_v24 = vpop.permute.xlu0 %1806 }
 0xb15   : > { %v1814_v26 = vsel %vm1078_vm6, %v1813_v25, %v1807_v24  ;;  %v2051_v24 = vrot.slane %v3062_v58, %v1230_v14 }
 0xb18   : > { %v1811_v27 = vpop.permute.xlu1 %1810 }
 0xb19   : > { %v1815_v28 = vsel %vm1080_vm7, %v1814_v26, %v1811_v27  ;;  %v2056_v26 = vrot.slane %v3062_v58, %v1289_v37 }
 0xb1a   : > { %v1816_v29 = vpack.c.bf16 %v1815_v28, %v1815_v28 }
 0xb1c   : > { %2504 = vmatmul.mubr.msk.bf16.vlgmr.msra.gmra.mxu1 %vm449_vm2, %v1816_v29 }
 0xb1d   : > { %2523 = vmatprep.mubr.msk.bf16.mxu1 %vm2761_vm1, %v2760_v2 }
 0xbdc   : > { %v1870_v32 = vpop.f32.mrf.mxu1 }
 0xbdd   : > { %v1871_v33 = vadd.f32 %v1870_v32, %v1820_v31 }
 0xbde   : > { %v2505_v35 = vpop.f32.mrf.mxu1 }
 0xbdf   : > { %v1876_v38 = vadd.f32 %v1871_v33, %v3070_v0  ;;  %v2624_v0 = vld [vmem:[%s2901_s30 + $0x18] sm:$0xff]  }
 0xbe0   : > { %v1873_v39 = vpop.f32.mrf.mxu1  ;;  %2516 = vmatpush3.bf16.msra.mxu1 %v2624_v0 }
 0xbe1   : > { %v1877_v41 = vsel %vm449_vm2, %v1876_v38, 0.0  ;;  %2517 = vmatprep.subr.bf16.mxu1 %v2760_v2 }
 0xbe2   : > { %1878 = vadd.xlane.f32.xlu0 %v1877_v41  ;;  %v2506_v42 = vpop.f32.mrf.mxu1 }
 0xbe4   : > { %2518 = vmatpush3.bf16.msra.mxu1 %v2625_v50 }
 0xbe5   : > { %2519 = vmatprep.subr.bf16.mxu1 %v2760_v2 }
 0xbe8   : > { %2520 = vmatpush3.bf16.msra.mxu1 %v2626_v59 }
 0xbe9   : > { %2521 = vmatprep.subr.bf16.mxu1 %v2760_v2 }
 0xbec   : > { %2522 = vmatpush3.bf16.msra.mxu1 %v2627_v60 }
 0xc6b   : > { %v1879_v44 = vpop.xlane.xlu0 %1878 }
 0xc6c   : > { %v1880_v45 = vmul.f32 0.03125, %v1879_v44 }
 0xc6e   : > { %v1881_v46 = vsub.f32 %v1876_v38, %v1880_v45 }
 0xc70   : > { %v1882_v47 = vmul.f32 %v1881_v46, %v1881_v46 }
 0xc72   : > { %v1883_v48 = vsel %vm449_vm2, %v1882_v47, 0.0 }
 0xc73   : > { %1884 = vadd.xlane.f32.xlu1 %v1883_v48 }
 0xcfc   : > { %v1885_v51 = vpop.xlane.xlu1 %1884 }
 0xcfd   : > { %v1886_v40 = vmul.f32 0.03125, %v1885_v51 }
 0xcff   : > { %v1887_v6 = vadd.f32 1e-05, %v1886_v40 }
 0xd01   : > { %2662 = vrsqrt.f32 %v1887_v6 }
 0xd0e   : > { %v2663_v53 = vpop.eup %2662 }
 0xd0f   : > { %v1889_v55 = vmul.f32 %v2663_v53, %v1881_v46 }
 0xd11   : > { %v1894_v56 = vmul.f32 %v1893_v52, %v1889_v55 }
 0xd13   : > { %v1899_v43 = vadd.f32 %v1898_v54, %v1894_v56 }
 0xd15   : > { %v1900_v57 = vpack.c.bf16 %v1899_v43, %v1899_v43 }
 0xd17   : > { %2512 = vmatmul.mubr.msk.bf16.vlgmr.msra.gmra.mxu0 %vm449_vm2, %v1900_v57 }
 0xdd7   : > { %v1954_v36 = vpop.f32.mrf.mxu0 }
 0xdd8   : > { %v1955_v62 = vadd.f32 %v1954_v36, %v1904_v61 }
 0xdd9   : > { %v2513_v63 = vpop.f32.mrf.mxu0 }
 0xdda   : > { %v1960_v1 = vmax.f32 %v1955_v62, 0.0 }
 0xddb   : > { %v1957_v34 = vpop.f32.mrf.mxu0 }
 0xddc   : > { %v1961_v20 = vpack.c.bf16 %v1960_v1, %v1960_v1 }
 0xddd   : > { %v2514_v3 = vpop.f32.mrf.mxu0 }
 0xdde   : > { %2524 = vmatmul.mubr.msk.bf16.vlgmr.msra.gmra.mxu1 %vm1990_vm8, %v1961_v20 }
 0xe9e   : > { %v2028_v5 = vpop.f32.mrf.mxu1 }
 0xe9f   : > { %v2029_v7 = vadd.f32 %v2028_v5, %v1965_v4 }
 0xea0   : > { %v2525_v2 = vpop.f32.mrf.mxu1 }
 0xea1   : > { %v2034_v8 = vadd.f32 %v2029_v7, %v1899_v43 }
 0xea2   : > { %v2031_v9 = vpop.f32.mrf.mxu1 }
 0xea3   : > { %v2035_v10 = vsel %vm449_vm2, %v2034_v8, 0.0 }
 0xea4   : > { %2036 = vadd.xlane.f32.xlu0 %v2035_v10  ;;  %v2526_v15 = vpop.f32.mrf.mxu1 }
 0xf2d   : > { %v2037_v16 = vpop.xlane.xlu0 %2036 }
 0xf2e   : > { %v2038_v17 = vmul.f32 0.03125, %v2037_v16 }
 0xf30   : > { %v2039_v18 = vsub.f32 %v2034_v8, %v2038_v17 }
 0xf32   : > { %v2040_v19 = vmul.f32 %v2039_v18, %v2039_v18 }
 0xf34   : > { %v2041_v21 = vsel %vm449_vm2, %v2040_v19, 0.0 }
 0xf35   : > { %2042 = vadd.xlane.f32.xlu0 %v2041_v21 }
 0xfbe   : > { %v2043_v12 = vpop.xlane.xlu0 %2042 }
 0xfbf   : > { %v2044_v22 = vmul.f32 0.03125, %v2043_v12 }
 0xfc1   : > { %v2045_v23 = vadd.f32 1e-05, %v2044_v22 }
 0xfc3   : > { %2664 = vrsqrt.f32 %v2045_v23 }
 0xfd0   : > { %v2665_v25 = vpop.eup %2664 }
 0xfd1   : > { %v2047_v27 = vmul.f32 %v2665_v25, %v2039_v18 }
 0xfd3   : > { %v2052_v28 = vmul.f32 %v2051_v24, %v2047_v27 }
 0xfd5   : > { %v2057_v29 = vadd.f32 %v2056_v26, %v2052_v28 }
 0xfd7   : > { %2058 = vst.msk [vmem:[%s2908_s23] sm:$0xff] %vm449_vm2, %v2057_v29 }
 0xfd8   : > { %2679 = shalt.err (!%p2676_p8)
}
 0xfd9   : > { %s2680_s30 = scalar_lea.hbm %s2071_s29, 128  ;;  %s2684_s11 = scalar_lea.hbm %s3262_s6, 256 }
 0xfda   : > { %p2681_p10 = scmp.ne.s32.totalorder %s2071_s29, %s2680_s30  ;;  %p2685_p13 = scmp.lt.s32.totalorder %s2071_s29, %s3262_s6 }
 0xfdb   : > { %p2686_p0 = scmp.lt.s32.totalorder %s2684_s11, %s2680_s30 }
 0xfdc   : > { %p2682_p11 = pnand %p2681_p10, %p2853_p3 }
 0xfdd   : > { %p2687_p1 = por %p2686_p0, %p2685_p13 }
 0xfde   : > { %p2683_p12 = pneg %p2682_p11 }
 0xfe0   : > { %p2688_p2 = pnand %p2687_p1, %p2683_p12 }
 0xfe2   : > { %2691 = shalt.err (!%p2688_p2)
}
 0xfe3   : > { %2527 = dma.vmem_to_hbm [thread:$0]  (%p2853_p3), %s2074_s14, 128, %s2071_s29, %s2060_s19  }
 0xfe4 PF: > { %s3284_s24 = sld [smem:[#allocation9_spill]] }
 0xfe5   : > { %s3285_s28 = sld [smem:[#allocation5_spill]] }
 0xfea   : > { %p2533_p4 = scmp.ge.s32.totalorder %s3284_s24, 2 }
 0xfeb   : > { %s2085_s10 = sand.u32 1, %s3285_s28  }
 0xfec   : > { %p2530_p5 = pnand %p2533_p4, %p2863_p9  ;;  %s2086_s13 = scalar_lea.sflag [#allocation3], %s2085_s10 }
 0xfee   : > { %p2531_p6 = pneg %p2530_p5 }
 0xff0   : > { %2725 = dma.done.wait (%p2531_p6), %s2086_s13, 128  }
 0xff1   : > { %2727 = vsyncadd (%p2531_p6), %s2086_s13, 4294967168  ;;  %s19_s28 = sadd.s32 1, %s3284_s24   ;;  %s3287_s26 = sld [smem:[#allocation6_spill]] }
 0xff2   : > { %p16_p7 = scmp.ge.s32.totalorder %s19_s28, 6   ;;  %s3288_s23 = sld [smem:[#allocation13_spill]] }
 0xff3   : > { %s3289_s24 = sld [smem:[#allocation7_spill]]  ;;  %s3293_s21 = smov %s2734_s22 }
 0xff4   : > { %s3290_s25 = sld [smem:[#allocation8_spill]] }
 0xff5   : > { %s3291_s9 = sld [smem:[#allocation10_spill]] }
 0xff6   : > { %s3292_s27 = sld [smem:[#allocation11_spill]] }
 0xff7   : > { %s3294_s22 = smov %s3287_s26  ;;  %18 = sbr.rel (!%p16_p7) target bundleno = 5 (0x5), region = 98 }
 0xffb   : > { %s3295_s26 = smov %s3291_s9 }
 0xffc   :  { %2091 = vsyncpa [#allocation3], 1 }
 0xffd   :  { %2093 = vsyncpa [#allocation3 + $0x1], 1 }

</bundles_post_ra>
